<compile_context>
chip_gen: v7x
topology: tpu7x:2x2x1
jax: 0.10.0
libtpu: 0.0.40
codegen_flags: <defaults>
</compile_context>

<pallas_src>
import functools

import jax
import jax.numpy as jnp
from jax.experimental import pallas as pl
from jax.experimental.pallas import tpu as pltpu


_LANE = 128
_TARGET_ROWS = 2048   # target TH*W per grid step (512-2048 amortises per-step
                      # overhead without blowing up the f32 accumulator)


def _pick_row_tile(H, W, target_rows=_TARGET_ROWS):
    """Largest row tile TH (divisor of H) whose flattened output TH*W is a
    multiple of 128 lanes and does not exceed `target_rows`.  Falls back to
    the smallest lane-dense divisor (if all exceed the target) or to the full
    height (stores become masked -- still correct, just slower)."""
    lane_dense = [th for th in range(1, H + 1)
                  if H % th == 0 and (th * W) % _LANE == 0]
    if not lane_dense:
        # TODO(synk): pad H*W up to a lane multiple instead of masked stores.
        return H
    fitting = [th for th in lane_dense if th * W <= target_rows]
    return max(fitting) if fitting else min(lane_dense)


def make_fused_head_kernel(TH, W, K, Cout, n_sigmoid):
    """Fused CenterNet head kernel for one (batch, row-tile) grid step."""
    THp = TH + 2           # rows needed including the 3x3 halo
    NROW = TH * W          # flattened output pixels of this tile (lane axis)

    def kernel(x_ref, w1_ref, b1_ref, w2_ref, b2_ref, out_ref, im2col_ref):
        # x_ref     : (H+2, W+2, K)  bf16 zero-padded NHWC frame (one batch elem)
        # w1_ref    : (3, 3K, KHp)   bf16 3x3 weights, dy-major, (dx,k_in) fused
        # b1_ref    : (1, KHp)       f32
        # w2_ref    : (Cout, KHp)    bf16 block-diag 1x1 weights, channels-first
        # b2_ref    : (Cout, 1)      f32
        # out_ref   : (Cout, TH*W)   f32 channels-first, lane-dense output block
        # im2col_ref: (THp*W, 3K)    bf16 VMEM scratch, dx taps fused into lanes
        t = pl.program_id(1)
        row0 = pl.multiple_of(t * TH, TH)
        xt = x_ref[pl.ds(row0, THp)]                     # (TH+2, W+2, K)

        # dx-fused im2col: 3 relayout copies (one per dx shift) into the lane
        # slices of one scratch.  The dy shift below is then a free, aligned
        # sublane slice of the flattened (rows, 3K) buffer (W % 8 == 0).
        for dx in range(3):
            im2col_ref[:, dx * K:(dx + 1) * K] = (
                xt[:, dx:dx + W, :].reshape(THp * W, K))
        col = im2col_ref[...]                            # (THp*W, 3K) bf16

        # 3x3 conv as 3 matmuls with contraction depth 3K, accumulated
        # back-to-back into a single f32 accumulator.
        acc = jnp.dot(col[0 * W:0 * W + NROW], w1_ref[0],
                      preferred_element_type=jnp.float32)
        acc = acc + jnp.dot(col[1 * W:1 * W + NROW], w1_ref[1],
                            preferred_element_type=jnp.float32)
        acc = acc + jnp.dot(col[2 * W:2 * W + NROW], w1_ref[2],
                            preferred_element_type=jnp.float32)

        hidden = jnp.maximum(acc + b1_ref[...], 0.0)     # (NROW, KHp) f32
        hidden = hidden.astype(w2_ref.dtype)             # bf16 for the MXU

        # 1x1 conv, produced directly channels-first: (Cout,KHp) x (NROW,KHp)^T
        out_cf = jax.lax.dot_general(
            w2_ref[...], hidden,
            dimension_numbers=(((1,), (1,)), ((), ())),
            preferred_element_type=jnp.float32)          # (Cout, NROW)
        out_cf = out_cf + b2_ref[...]                    # bias along lanes

        # sigmoid on the leading (class + offset) rows, identity on size rows,
        # via two static row-slice stores (no iota / select / wasted EUP work).
        if n_sigmoid > 0:
            out_ref[0:n_sigmoid, :] = jax.nn.sigmoid(out_cf[0:n_sigmoid, :])
        if n_sigmoid < Cout:
            out_ref[n_sigmoid:, :] = out_cf[n_sigmoid:, :]

    return kernel


def fuse_head_params(params):
    """Stack per-head weights into the fused tensors used by the kernel.

    Returns (w1, b1, w2, b2, n_sig):
      w1: (3, 3K, KHp)  dy-major, (dx, k_in) fused into the contraction axis,
                        hidden width zero-padded to a multiple of 128 lanes
      b1: (1, KHp)
      w2: (Cout, KHp)   block-diagonal 1x1 weights, channels-first
      b2: (Cout, 1)
    """
    # 3x3 convs: concat output channels -> (3, 3, K, KH)
    w1_all = jnp.concatenate([p[0] for p in params], axis=-1)
    _, _, K, KH = w1_all.shape
    KHp = -(-KH // _LANE) * _LANE            # hidden width padded to 128 lanes
    pad = KHp - KH
    w1_all = jnp.pad(w1_all, ((0, 0), (0, 0), (0, 0), (0, pad)))
    w1_all = w1_all.reshape(3, 3 * K, KHp)   # index = dy, dx*K + k_in, kh
    b1_all = jnp.pad(jnp.concatenate([p[1] for p in params]), (0, pad))
    b1_all = b1_all.reshape(1, KHp)

    # 1x1 convs: block-diagonal (KHp, Cout), stored channels-first (Cout, KHp)
    couts = [p[2].shape[1] for p in params]
    Cout = sum(couts)
    w2_bd = jnp.zeros((KHp, Cout), jnp.float32)
    off = 0
    for i, p in enumerate(params):
        w2_bd = w2_bd.at[i * K:(i + 1) * K, off:off + couts[i]].set(p[2])
        off += couts[i]
    w2_cf = w2_bd.T                                      # (Cout, KHp)
    b2_cf = jnp.concatenate([p[3] for p in params]).reshape(Cout, 1)

    # sigmoid heads must form a prefix of the output channels (class, offset)
    sig_flags = []
    for p in params:
        sig_flags += [bool(p[4])] * p[2].shape[1]
    assert sig_flags == sorted(sig_flags, reverse=True), \
        "sigmoid heads must precede non-sigmoid heads"
    n_sig = sum(sig_flags)
    return w1_all, b1_all, w2_cf, b2_cf, n_sig


def centernet_head_forward(x_nchw, params, compute_dtype=jnp.bfloat16):
    """PyTorch-equivalent CenterNetHead forward.

    x_nchw : (B, K, H, W) float32
    params : list of (w3x3[3,3,K,K] HWIO, b3x3[K], w1x1[K,cout], b1x1[cout], sigmoid)
             in order [class_head, offset_head, size_head]
    returns: (B, C+4, H, W) float32 (NCHW, matching torch.cat(dim=1))
    """
    B, K, H, W = x_nchw.shape
    w1, b1, w2, b2, n_sig = fuse_head_params(params)
    KHp = w1.shape[2]
    Cout = w2.shape[0]

    # Single fused XLA pre-pass: NCHW->NHWC + SAME halo pad + bf16 cast.
    # TODO(synk): fold this transpose/pad/cast into the kernel to remove the
    # extra HBM round trip (channels-first matmul formulation).
    x_pad = jnp.pad(jnp.transpose(x_nchw, (0, 2, 3, 1)),
                    ((0, 0), (1, 1), (1, 1), (0, 0))).astype(compute_dtype)
    Hp, Wp = H + 2, W + 2

    TH = _pick_row_tile(H, W)
    T = H // TH
    THp, NROW = TH + 2, TH * W

    # Rough VMEM working-set estimate -> scoped limit (defaults are 16/32 MiB).
    vmem_est = (2 * Hp * Wp * max(K, _LANE) * 2          # double-buffered frame
                + THp * W * max(3 * K, _LANE) * 2        # im2col scratch
                + NROW * KHp * (4 + 2 + 4)               # acc f32 + hidden bf16 + slack
                + 2 * 8 * NROW * 4                       # double-buffered out block
                + 4 * KHp * (3 * K + Cout) * 2           # weights (2 buffers)
                + (4 << 20))                             # headroom
    vmem_limit = int(min(max(vmem_est, 32 << 20), 100 << 20))

    kernel = make_fused_head_kernel(TH, W, K, Cout, n_sig)
    out_flat = pl.pallas_call(
        kernel,
        out_shape=jax.ShapeDtypeStruct((B, Cout, H * W), jnp.float32),
        grid=(B, T),
        in_specs=[
            # Whole padded frame per batch element; index depends only on b so
            # with B outer / T inner it is DMA'd once per batch element.
            # TODO(synk): halo-row-tiled input block via manual make_async_copy
            # double buffering for frames larger than v7x's 64 MiB VMEM.
            pl.BlockSpec((None, Hp, Wp, K), lambda b, t: (b, 0, 0, 0)),
            pl.BlockSpec((3, 3 * K, KHp), lambda b, t: (0, 0, 0)),
            pl.BlockSpec((1, KHp), lambda b, t: (0, 0)),
            pl.BlockSpec((Cout, KHp), lambda b, t: (0, 0)),
            pl.BlockSpec((Cout, 1), lambda b, t: (0, 0)),
        ],
        out_specs=pl.BlockSpec((None, Cout, NROW), lambda b, t: (b, 0, t)),
        scratch_shapes=[pltpu.VMEM((THp * W, 3 * K), compute_dtype)],
        compiler_params=pltpu.CompilerParams(
            dimension_semantics=("parallel", "parallel"),
            vmem_limit_bytes=vmem_limit),
    )(x_pad,
      w1.astype(compute_dtype),
      b1.astype(jnp.float32),
      w2.astype(compute_dtype),
      b2.astype(jnp.float32))

    # (B, C+4, H*W) -> (B, C+4, H, W): pure metadata reshape, no transpose.
    return out_flat.reshape(B, Cout, H, W)


def init_params(key, k_in_channels, c_classes):
    """Deterministic PyTorch-Conv2d-style uniform init (synthetic weights)."""
    def conv_init(k, kh, kw, cin, cout):
        k_w, k_b = jax.random.split(k)
        bound = 1.0 / jnp.sqrt(float(cin * kh * kw))
        w = jax.random.uniform(k_w, (kh, kw, cin, cout), jnp.float32,
                               -bound, bound)
        b = jax.random.uniform(k_b, (cout,), jnp.float32, -bound, bound)
        return w, b

    K, C = k_in_channels, c_classes
    keys = jax.random.split(key, 6)
    params = []
    head_specs = [(C, True), (2, True), (2, False)]   # class, offset, size
    for i, (cout, sig) in enumerate(head_specs):
        w1, b1 = conv_init(keys[2 * i], 3, 3, K, K)
        w2_full, b2 = conv_init(keys[2 * i + 1], 1, 1, K, cout)
        params.append((w1, b1, w2_full[0, 0], b2, sig))
    return params


def reference_forward(x_nchw, params):
    """Pure-JAX f32 reference (lax conv) for verification."""
    x = jnp.transpose(x_nchw, (0, 2, 3, 1))
    outs = []
    for (w1, b1, w2, b2, sig) in params:
        h = jax.lax.conv_general_dilated(
            x, w1, (1, 1), "SAME",
            dimension_numbers=("NHWC", "HWIO", "NHWC")) + b1
        h = jnp.maximum(h, 0.0)
        o = jnp.einsum("bhwk,kc->bhwc", h, w2) + b2
        if sig:
            o = jax.nn.sigmoid(o)
        outs.append(o)
    return jnp.transpose(jnp.concatenate(outs, -1), (0, 3, 1, 2))


if __name__ == "__main__":
    B, K, H, W = 2, 32, 16, 16     # small shapes: batch=2, K channels, 16x16 featuremap
    C_CLASSES = 2

    key = jax.random.PRNGKey(0)
    k_x, k_p = jax.random.split(key)
    x = jax.random.normal(k_x, (B, K, H, W), jnp.float32)
    params = init_params(k_p, K, C_CLASSES)

    fwd = jax.jit(functools.partial(centernet_head_forward, params=params))
    y = fwd(x)
    jax.block_until_ready(y)

    assert y.shape == (B, C_CLASSES + 4, H, W), y.shape

    y_ref = reference_forward(x, params)
    max_err = float(jnp.max(jnp.abs(y - y_ref)))
    # bf16 inputs/weights with f32 accumulation: loosened tolerance vs pure f32.
    assert jnp.allclose(y, y_ref, atol=2e-2, rtol=2e-2), max_err

    print("KERNEL_OK")
</pallas_src>

<mosaic_0001>
module attributes {stable_mosaic.version = 11 : i64} {
  func.func @kernel(%arg0: i32, %arg1: i32, %arg2: memref<1x18x18x32xbf16, #tpu.memory_space<vmem>>, %arg3: memref<3x96x128xbf16, #tpu.memory_space<vmem>>, %arg4: memref<1x128xf32, #tpu.memory_space<vmem>>, %arg5: memref<6x128xbf16, #tpu.memory_space<vmem>>, %arg6: memref<6x1xf32, #tpu.memory_space<vmem>>, %arg7: memref<1x6x256xf32, #tpu.memory_space<vmem>>, %arg8: memref<288x96xbf16, #tpu.memory_space<vmem>>) attributes {dimension_semantics = [#tpu.dimension_semantics<parallel>, #tpu.dimension_semantics<parallel>], iteration_bounds = array<i64: 2, 1>, scalar_prefetch = 0 : i64, scratch_operands = 1 : i64, tpu.core_type = #tpu.core_type<tc>, window_params = [{transform_indices = @transform_0, window_bounds = array<i64: 1, 18, 18, 32>}, {pipeline_mode = #tpu.pipeline_mode<synchronous>, transform_indices = @transform_1, window_bounds = array<i64: 3, 96, 128>}, {pipeline_mode = #tpu.pipeline_mode<synchronous>, transform_indices = @transform_2, window_bounds = array<i64: 1, 128>}, {pipeline_mode = #tpu.pipeline_mode<synchronous>, transform_indices = @transform_3, window_bounds = array<i64: 6, 128>}, {pipeline_mode = #tpu.pipeline_mode<synchronous>, transform_indices = @transform_4, window_bounds = array<i64: 6, 1>}, {transform_indices = @transform_5, window_bounds = array<i64: 1, 6, 256>}]} {
    %c16_i32 = arith.constant 16 : i32
    %0 = arith.muli %arg1, %c16_i32 : i32
    %1 = tpu.assume_multiple %0, 16 : i32
    %c0 = arith.constant 0 : index
    %2 = arith.index_cast %1 : i32 to index
    %c0_0 = arith.constant 0 : index
    %c0_1 = arith.constant 0 : index
    %3 = vector.load %arg2[%c0, %2, %c0_0, %c0_1] : memref<1x18x18x32xbf16, #tpu.memory_space<vmem>>, vector<1x18x18x32xbf16>
    %4 = vector.shape_cast %3 : vector<1x18x18x32xbf16> to vector<18x18x32xbf16>
    %5 = vector.extract_strided_slice %4 {offsets = [0, 0, 0], sizes = [18, 16, 32], strides = [1, 1, 1]} : vector<18x18x32xbf16> to vector<18x16x32xbf16>
    %6 = vector.shape_cast %5 : vector<18x16x32xbf16> to vector<288x32xbf16>
    %c0_2 = arith.constant 0 : index
    %c0_3 = arith.constant 0 : index
    %7 = vector.load %arg8[%c0_2, %c0_3] : memref<288x96xbf16, #tpu.memory_space<vmem>>, vector<288x32xbf16>
    tpu.vector_store %arg8[%c0_2, %c0_3], %6 {strides = array<i32>} : memref<288x96xbf16, #tpu.memory_space<vmem>>, vector<288x32xbf16>,
    %8 = vector.extract_strided_slice %4 {offsets = [0, 1, 0], sizes = [18, 16, 32], strides = [1, 1, 1]} : vector<18x18x32xbf16> to vector<18x16x32xbf16>
    %9 = vector.shape_cast %8 : vector<18x16x32xbf16> to vector<288x32xbf16>
    %c0_4 = arith.constant 0 : index
    %c32 = arith.constant 32 : index
    %10 = vector.load %arg8[%c0_4, %c32] : memref<288x96xbf16, #tpu.memory_space<vmem>>, vector<288x32xbf16>
    tpu.vector_store %arg8[%c0_4, %c32], %9 {strides = array<i32>} : memref<288x96xbf16, #tpu.memory_space<vmem>>, vector<288x32xbf16>,
    %11 = vector.extract_strided_slice %4 {offsets = [0, 2, 0], sizes = [18, 16, 32], strides = [1, 1, 1]} : vector<18x18x32xbf16> to vector<18x16x32xbf16>
    %12 = vector.shape_cast %11 : vector<18x16x32xbf16> to vector<288x32xbf16>
    %c0_5 = arith.constant 0 : index
    %c64 = arith.constant 64 : index
    %13 = vector.load %arg8[%c0_5, %c64] : memref<288x96xbf16, #tpu.memory_space<vmem>>, vector<288x32xbf16>
    tpu.vector_store %arg8[%c0_5, %c64], %12 {strides = array<i32>} : memref<288x96xbf16, #tpu.memory_space<vmem>>, vector<288x32xbf16>,
    %c0_6 = arith.constant 0 : index
    %c0_7 = arith.constant 0 : index
    %14 = vector.load %arg8[%c0_6, %c0_7] : memref<288x96xbf16, #tpu.memory_space<vmem>>, vector<288x96xbf16>
    %15 = vector.extract_strided_slice %14 {offsets = [0, 0], sizes = [256, 96], strides = [1, 1]} : vector<288x96xbf16> to vector<256x96xbf16>
    %c0_8 = arith.constant 0 : index
    %c0_9 = arith.constant 0 : index
    %c0_10 = arith.constant 0 : index
    %16 = vector.load %arg3[%c0_8, %c0_9, %c0_10] : memref<3x96x128xbf16, #tpu.memory_space<vmem>>, vector<1x96x128xbf16>
    %17 = vector.shape_cast %16 : vector<1x96x128xbf16> to vector<96x128xbf16>
    %cst = arith.constant dense<0.000000e+00> : vector<256x128xf32>
    %18 = tpu.matmul %15, %17, %cst {dimension_numbers = #tpu.dot_dimension_numbers<[1], [0], [0], [1], [0, 0, 1, 1], [], []>} : vector<256x96xbf16>, vector<96x128xbf16>, vector<256x128xf32> -> vector<256x128xf32>
    %19 = vector.extract_strided_slice %14 {offsets = [16, 0], sizes = [256, 96], strides = [1, 1]} : vector<288x96xbf16> to vector<256x96xbf16>
    %c1 = arith.constant 1 : index
    %c0_11 = arith.constant 0 : index
    %c0_12 = arith.constant 0 : index
    %20 = vector.load %arg3[%c1, %c0_11, %c0_12] : memref<3x96x128xbf16, #tpu.memory_space<vmem>>, vector<1x96x128xbf16>
    %21 = vector.shape_cast %20 : vector<1x96x128xbf16> to vector<96x128xbf16>
    %cst_13 = arith.constant dense<0.000000e+00> : vector<256x128xf32>
    %22 = tpu.matmul %19, %21, %cst_13 {dimension_numbers = #tpu.dot_dimension_numbers<[1], [0], [0], [1], [0, 0, 1, 1], [], []>} : vector<256x96xbf16>, vector<96x128xbf16>, vector<256x128xf32> -> vector<256x128xf32>
    %23 = arith.addf %18, %22 : vector<256x128xf32>
    %24 = vector.extract_strided_slice %14 {offsets = [32, 0], sizes = [256, 96], strides = [1, 1]} : vector<288x96xbf16> to vector<256x96xbf16>
    %c2 = arith.constant 2 : index
    %c0_14 = arith.constant 0 : index
    %c0_15 = arith.constant 0 : index
    %25 = vector.load %arg3[%c2, %c0_14, %c0_15] : memref<3x96x128xbf16, #tpu.memory_space<vmem>>, vector<1x96x128xbf16>
    %26 = vector.shape_cast %25 : vector<1x96x128xbf16> to vector<96x128xbf16>
    %cst_16 = arith.constant dense<0.000000e+00> : vector<256x128xf32>
    %27 = tpu.matmul %24, %26, %cst_16 {dimension_numbers = #tpu.dot_dimension_numbers<[1], [0], [0], [1], [0, 0, 1, 1], [], []>} : vector<256x96xbf16>, vector<96x128xbf16>, vector<256x128xf32> -> vector<256x128xf32>
    %28 = arith.addf %23, %27 : vector<256x128xf32>
    %c0_17 = arith.constant 0 : index
    %c0_18 = arith.constant 0 : index
    %29 = vector.load %arg4[%c0_17, %c0_18] : memref<1x128xf32, #tpu.memory_space<vmem>>, vector<1x128xf32>
    %30 = vector.broadcast %29 : vector<1x128xf32> to vector<256x128xf32>
    %31 = arith.addf %28, %30 : vector<256x128xf32>
    %cst_19 = arith.constant 0.000000e+00 : f32
    %32 = vector.broadcast %cst_19 : f32 to vector<256x128xf32>
    %33 = arith.maximumf %31, %32 : vector<256x128xf32>
    %34 = arith.truncf %33 : vector<256x128xf32> to vector<256x128xbf16>
    %c0_20 = arith.constant 0 : index
    %c0_21 = arith.constant 0 : index
    %35 = vector.load %arg5[%c0_20, %c0_21] : memref<6x128xbf16, #tpu.memory_space<vmem>>, vector<6x128xbf16>
    %cst_22 = arith.constant dense<0.000000e+00> : vector<6x256xf32>
    %36 = tpu.matmul %35, %34, %cst_22 {dimension_numbers = #tpu.dot_dimension_numbers<[1], [1], [0], [0], [0, 0, 1, 0], [], []>} : vector<6x128xbf16>, vector<256x128xbf16>, vector<6x256xf32> -> vector<6x256xf32>
    %c0_23 = arith.constant 0 : index
    %c0_24 = arith.constant 0 : index
    %37 = vector.load %arg6[%c0_23, %c0_24] : memref<6x1xf32, #tpu.memory_space<vmem>>, vector<6x1xf32>
    %38 = vector.broadcast %37 : vector<6x1xf32> to vector<6x256xf32>
    %39 = arith.addf %36, %38 : vector<6x256xf32>
    %40 = vector.extract_strided_slice %39 {offsets = [0, 0], sizes = [4, 256], strides = [1, 1]} : vector<6x256xf32> to vector<4x256xf32>
    %41 = arith.negf %40 : vector<4x256xf32>
    %42 = math.exp %41 : vector<4x256xf32>
    %cst_25 = arith.constant 1.000000e+00 : f32
    %43 = vector.broadcast %cst_25 : f32 to vector<4x256xf32>
    %44 = arith.addf %43, %42 : vector<4x256xf32>
    %45 = arith.divf %43, %44 : vector<4x256xf32>
    %c0_26 = arith.constant 0 : index
    %c0_27 = arith.constant 0 : index
    %c0_28 = arith.constant 0 : index
    %46 = vector.load %arg7[%c0_26, %c0_27, %c0_28] : memref<1x6x256xf32, #tpu.memory_space<vmem>>, vector<1x4x256xf32>
    %47 = vector.shape_cast %46 : vector<1x4x256xf32> to vector<4x256xf32>
    %48 = vector.shape_cast %45 : vector<4x256xf32> to vector<1x4x256xf32>
    tpu.vector_store %arg7[%c0_26, %c0_27, %c0_28], %48 {strides = array<i32>} : memref<1x6x256xf32, #tpu.memory_space<vmem>>, vector<1x4x256xf32>,
    %49 = vector.extract_strided_slice %39 {offsets = [4, 0], sizes = [2, 256], strides = [1, 1]} : vector<6x256xf32> to vector<2x256xf32>
    %c0_29 = arith.constant 0 : index
    %c4 = arith.constant 4 : index
    %c0_30 = arith.constant 0 : index
    %50 = vector.load %arg7[%c0_29, %c4, %c0_30] : memref<1x6x256xf32, #tpu.memory_space<vmem>>, vector<1x2x256xf32>
    %51 = vector.shape_cast %50 : vector<1x2x256xf32> to vector<2x256xf32>
    %52 = vector.shape_cast %49 : vector<2x256xf32> to vector<1x2x256xf32>
    tpu.vector_store %arg7[%c0_29, %c4, %c0_30], %52 {strides = array<i32>} : memref<1x6x256xf32, #tpu.memory_space<vmem>>, vector<1x2x256xf32>,
    return
  }
  func.func @transform_0(%arg0: i32, %arg1: i32) -> (i32, i32, i32, i32) {
    %c0_i32 = arith.constant 0 : i32
    %c0_i32_0 = arith.constant 0 : i32
    %c0_i32_1 = arith.constant 0 : i32
    %c0_i32_2 = arith.constant 0 : i32
    return %arg0, %c0_i32, %c0_i32_0, %c0_i32_1 : i32, i32, i32, i32
  }
  func.func @transform_1(%arg0: i32, %arg1: i32) -> (i32, i32, i32) {
    %c0_i32 = arith.constant 0 : i32
    %c0_i32_0 = arith.constant 0 : i32
    %c0_i32_1 = arith.constant 0 : i32
    %c0_i32_2 = arith.constant 0 : i32
    return %c0_i32, %c0_i32_0, %c0_i32_1 : i32, i32, i32
  }
  func.func @transform_2(%arg0: i32, %arg1: i32) -> (i32, i32) {
    %c0_i32 = arith.constant 0 : i32
    %c0_i32_0 = arith.constant 0 : i32
    %c0_i32_1 = arith.constant 0 : i32
    return %c0_i32, %c0_i32_0 : i32, i32
  }
  func.func @transform_3(%arg0: i32, %arg1: i32) -> (i32, i32) {
    %c0_i32 = arith.constant 0 : i32
    %c0_i32_0 = arith.constant 0 : i32
    %c0_i32_1 = arith.constant 0 : i32
    return %c0_i32, %c0_i32_0 : i32, i32
  }
  func.func @transform_4(%arg0: i32, %arg1: i32) -> (i32, i32) {
    %c0_i32 = arith.constant 0 : i32
    %c0_i32_0 = arith.constant 0 : i32
    %c0_i32_1 = arith.constant 0 : i32
    return %c0_i32, %c0_i32_0 : i32, i32
  }
  func.func @transform_5(%arg0: i32, %arg1: i32) -> (i32, i32, i32) {
    %c0_i32 = arith.constant 0 : i32
    %c0_i32_0 = arith.constant 0 : i32
    return %arg0, %c0_i32, %arg1 : i32, i32, i32
  }
}

</mosaic_0001>

<bundles_post_ra>
// kernel: centernet_head_forward.1
= control target key start
LH: loop header
LB: loop body
LE: loop exit
PB: predicated region body
PF: predicated region fallthrough
CT: control target
= control target key end

     0   :  { %s2811_s18 = smov 0   ;;  %s2813_s19 = smov 0   ;;  %s3649_s0 = inlined_call_operand.vmem [shape: bf16[2,18,18,32], index: 0, kind: input, shape index: {}]   ;;  %s3650_s1 = inlined_call_operand.vmem [shape: bf16[3,96,128], index: 1, kind: input, shape index: {}]   ;;  %s3651_s2 = inlined_call_operand.vmem [shape: f32[1,128], index: 2, kind: input, shape index: {}]   ;;  %s3652_s3 = inlined_call_operand.vmem [shape: bf16[6,128], index: 3, kind: input, shape index: {}]   ;;  %s3653_s4 = inlined_call_operand.vmem [shape: f32[6,1], index: 4, kind: input, shape index: {}]   ;;  %s3654_s5 = inlined_call_operand.vmem [shape: f32[2,6,256], index: 5, kind: output, shape index: {}]  }
   0x1   :  { %s2815_s20 = smov 0  }
   0x2 LB: > { %s27_s21 = sadd.s32 1, %s2772_s19  ;;  %p2242_p0 = scmp.ge.s32.totalorder %s2776_s20, 1  ;;  %s2776_s20 = sphi %s2815_s20, %s15_s20   ;;  %s2772_s19 = sphi %s2813_s19, %s3660_s19   ;;  %s2768_s18 = sphi %s2811_s18, %s3659_s18  }
   0x3   : > { %p29_p1 = scmp.ge.s32.totalorder %s27_s21, 2  ;;  %p201_p2 = scmp.lt.s32.totalorder %s2776_s20, 3 }
   0x5   : > { %s3662_s21 = smov (%p29_p1, %s27_s21), 0  ;;  %p202_p3 = pnand %p2242_p0, %p201_p2 }
   0x6   : > { %p233_p4 = scmp.lt.s32.totalorder (!%p202_p3), %s2768_s18, 1  ;;  %v2723_v0 = vld [vmem:[%s3650_s1] sm:$0xff] (!%p202_p3)   ;;  %vm434_vm0 = vsmask.f32 (!%p202_p3), 3328  ;;  %vm435_vm1 = vsmask.f32 (!%p202_p3), 7440 }
   0x7   : > { %205 = sbr.rel (%p202_p3) target bundleno = 813 (0x32d), region = 40  ;;  %vm1014_vm2 = vcmask (!%p202_p3), 1042432   ;;  %2542 = vmatprep.subr.bf16.mxu0 (!%p202_p3), %v2723_v0  ;;  %v2724_v1 = vld [vmem:[%s3650_s1 + $0x8] sm:$0xff] (!%p202_p3)   ;;  %v2725_v2 = vld [vmem:[%s3650_s1 + $0x30] sm:$0xff] (!%p202_p3)   ;;  %vm1015_vm3 = vcmask (!%p202_p3), 1046532   ;;  %v2728_v4 = vld [vmem:[%s3650_s1 + $0x38] sm:$0xff] (!%p202_p3)  }
   0x8   : > { %2543 = vmatpush3.bf16.msra.mxu0 (!%p202_p3), %v2723_v0  ;;  %v2726_v3 = vld [vmem:[%s3650_s1 + $0x10] sm:$0xff] (!%p202_p3)   ;;  %2498 = vmatprep.subr.bf16.mxu1 (!%p202_p3), %v2725_v2  ;;  %vm2856_vm4 = vmor (!%p202_p3), %vm1014_vm2, %vm1015_vm3  ;;  %v2729_v28 = vld [vmem:[%s3650_s1 + $0x18] sm:$0xff] (!%p202_p3)   ;;  %s2778_s17 = smov (!%p202_p3), 64   ;;  %s2779_s24 = smov (!%p202_p3), 32   ;;  %vm415_vm6 = vcmask (!%p202_p3), 261120   ;;  %vm977_vm7 = vcmask (!%p202_p3), 523520  }
   0x9   : > { %2544 = vmatprep.subr.bf16.mxu0 (!%p202_p3), %v2724_v1  ;;  %2499 = vmatpush3.bf16.msra.mxu1 (!%p202_p3), %v2725_v2  ;;  %vm2873_vm5 = vmor (!%p202_p3), %vm434_vm0, %vm435_vm1  ;;  %v2730_v38 = vld [vmem:[%s3650_s1 + $0x40] sm:$0xff] (!%p202_p3)   ;;  %v2732_v63 = vld [vmem:[%s3650_s1 + $0x48] sm:$0xff] (!%p202_p3)   ;;  %vm1251_vm8 = vcmask (!%p202_p3), 785920   ;;  %vm1349_vm9 = vcmask (!%p202_p3), 785408  }
   0xa   : > { %2500 = vmatprep.subr.bf16.mxu1 (!%p202_p3), %v2728_v4  ;;  %v2731_v44 = vld [vmem:[%s3650_s1 + $0x20] sm:$0xff] (!%p202_p3)  }
   0xc   : > { %2545 = vmatpush3.bf16.msra.mxu0 (!%p202_p3), %v2724_v1 }
   0xd   : > { %2546 = vmatprep.subr.bf16.mxu0 (!%p202_p3), %v2726_v3  ;;  %2501 = vmatpush3.bf16.msra.mxu1 (!%p202_p3), %v2728_v4 }
   0xe   : > { %s3664_s18 = smov (!%p233_p4, %s2768_s18), 1  ;;  %2502 = vmatprep.subr.bf16.mxu1 %v2730_v38 }
   0xf   : > { %s2694_s26 = smul.u32 216, %s3664_s18  ;;  %s2413_s30 = sshll.u32 %s3664_s18, 4 }
  0x10   : > { %2547 = vmatpush3.bf16.msra.mxu0 %v2726_v3 }
  0x11   : > { %s2847_s8 = scalar_lea.vmem %s3649_s0, %s2694_s26  ;;  %2548 = vmatprep.subr.bf16.mxu0 %v2729_v28  ;;  %2503 = vmatpush3.bf16.msra.mxu1 %v2730_v38 }
  0x12   : > { %v253_v5 = vld [vmem:[%s2847_s8] sm:$0xf]  ;;  %v254_v6 = vld [vmem:[%s2847_s8 + $0x4] sm:$0xf]  ;;  %v255_v7 = vld [vmem:[%s2847_s8 + $0x8] sm:$0x1]  ;;  %2504 = vmatprep.subr.bf16.mxu1 %v2732_v63 }
  0x13   : > { %v438_v8 = vshrl.u32 %v253_v5, 16  ;;  %v441_v9 = vshll.u32 %v253_v5, 16  ;;  %v447_v10 = vshll.u32 %v254_v6, 16  ;;  %v451_v11 = vshrl.u32 %v254_v6, 16  ;;  %v256_v13 = vld [vmem:[%s2847_s8 + $0xc] sm:$0xf] }
  0x14   : > { %v457_v14 = vshll.u32 %v255_v7, 16  ;;  %v2282_v15 = vrot.slane %v253_v5, 9  ;;  %v1019_v16 = vrot.slane %v254_v6, 5  ;;  %v1022_v17 = vrot.slane %v255_v7, 5  ;;  %v2862_v18 = vld [vmem:[%s2847_s8 + $0x10] sm:$0xf]  ;;  %2549 = vmatpush3.bf16.msra.mxu0 %v2729_v28 }
  0x15   : > { %v440_v19 = vrot.slane %v438_v8, 4  ;;  %v443_v20 = vrot.slane %v441_v9, 5  ;;  %v449_v21 = vrot.slane %v447_v10, 5  ;;  %v453_v22 = vrot.slane %v451_v11, 4  ;;  %v258_v23 = vld [vmem:[%s2847_s8 + $0x14] sm:$0x1]  ;;  %2550 = vmatprep.subr.bf16.mxu0 %v2731_v44  ;;  %2505 = vmatpush3.bf16.msra.mxu1 %v2732_v63 }
  0x16   : > { %v459_v24 = vrot.slane %v457_v14, 5  ;;  %v1020_v25 = vsel %vm2856_vm4, %v2282_v15, %v1019_v16  ;;  %v1021_v26 = vrot.slane %v1019_v16, 4  ;;  %v462_v27 = vshrl.u32 %v256_v13, 16  ;;  %v2884_v43 = vld [vmem:[%s2847_s8 + $0x18] sm:$0xf] }
  0x17   : > { %v444_v29 = vor.u32 %v443_v20, %v440_v19  ;;  %v454_v30 = vor.u32 %v453_v22, %v449_v21  ;;  %v465_v31 = vshll.u32 %v256_v13, 16  ;;  %v471_v32 = vshll.u32 %v2862_v18, 16  ;;  %v2896_v53 = vld [vmem:[%s2847_s8 + $0x1c] sm:$0xf]  ;;  %v2899_v57 = vld [vmem:[%s2847_s8 + $0x20] sm:$0x1] }
  0x18   : > { %v1023_v34 = vsel %vm2856_vm4, %v1021_v26, %v1022_v17  ;;  %v464_v35 = vrot.slane %v462_v27, 4  ;;  %v475_v36 = vshrl.u32 %v2862_v18, 16  ;;  %v481_v37 = vshll.u32 %v258_v23, 16  ;;  %v2912_v4 = vld [vmem:[%s2847_s8 + $0x24] sm:$0xf]  ;;  %2551 = vmatpush3.bf16.msra.mxu0 %v2731_v44 }
  0x19   : > { %v445_v39 = vrot.slane %v444_v29, 4  ;;  %v455_v40 = vrot.slane %v454_v30, 4  ;;  %v2300_v41 = vcombine.low %v1020_v25, %v1023_v34  ;;  %v467_v42 = vrot.slane %v465_v31, 5  ;;  %v2920_v9 = vld [vmem:[%s2847_s8 + $0x28] sm:$0xf] }
  0x1a   : > { %v473_v45 = vrot.slane %v471_v32, 5  ;;  %v477_v46 = vrot.slane %v475_v36, 4  ;;  %v483_v47 = vrot.slane %v481_v37, 5  ;;  %v2283_v48 = vrot.slane %v256_v13, 9  ;;  %v264_v15 = vld [vmem:[%s2847_s8 + $0x2c] sm:$0x1] }
  0x1b   : > { %v450_v49 = vsel %vm2873_vm5, %v445_v39, %v449_v21  ;;  %v460_v50 = vsel %vm2873_vm5, %v455_v40, %v459_v24  ;;  %1197 = vrot.lane.b32.xlu1 %v2300_v41, %s2778_s17  ;;  %v468_v51 = vor.u32 %v467_v42, %v464_v35  ;;  %v1026_v52 = vrot.slane %v2862_v18, 5  ;;  %v2733_v25 = vld [vmem:[%s3650_s1 + $0x28] sm:$0xff]   ;;  %v2940_v39 = vld [vmem:[%s2847_s8 + $0x30] sm:$0xf] }
  0x1c   : > { %v2264_v54 = vcombine.low %v450_v49, %v460_v50  ;;  %v478_v55 = vor.u32 %v477_v46, %v473_v45  ;;  %v1029_v56 = vrot.slane %v258_v23, 5  ;;  %v486_v58 = vshrl.u32 %v2884_v43, 16  ;;  %2552 = vmatprep.subr.bf16.mxu0 %v2733_v25  ;;  %v2734_v40 = vld [vmem:[%s3650_s1 + $0x50] sm:$0xff]   ;;  %v2735_v46 = vld [vmem:[%s3650_s1 + $0x60] sm:$0xff]  }
  0x1d   : > { %v469_v59 = vrot.slane %v468_v51, 4  ;;  %v1027_v60 = vsel %vm2856_vm4, %v2283_v48, %v1026_v52  ;;  %v1028_v61 = vrot.slane %v1026_v52, 4  ;;  %v489_v62 = vshll.u32 %v2884_v43, 16  ;;  %2553 = vmatpush3.bf16.msra.mxu0 %v2733_v25  ;;  %2506 = vmatprep.subr.bf16.mxu1 %v2734_v40 }
  0x1e   : > { %923 = vrot.lane.b32.xlu0 %v2264_v54, %s2779_s24  ;;  %v479_v0 = vrot.slane %v478_v55, 4  ;;  %v488_v1 = vrot.slane %v486_v58, 4  ;;  %v495_v2 = vshll.u32 %v2896_v53, 16  ;;  %v499_v3 = vshrl.u32 %v2896_v53, 16  ;;  %v2955_v55 = vld [vmem:[%s2847_s8 + $0x34] sm:$0xf]  ;;  %2507 = vmatpush3.bf16.msra.mxu1 %v2734_v40 }
  0x1f   : > { %v474_v5 = vsel %vm2873_vm5, %v469_v59, %v473_v45  ;;  %v1030_v6 = vsel %vm2856_vm4, %v1028_v61, %v1029_v56  ;;  %v491_v7 = vrot.slane %v489_v62, 5  ;;  %v505_v8 = vshll.u32 %v2899_v57, 16  ;;  %2586 = vmatprep.subr.bf16.mxu0 %v2735_v46  ;;  %v2966_v62 = vld [vmem:[%s2847_s8 + $0x3c] sm:$0xf]  ;;  %v2995_v40 = vld [vmem:[%s2847_s8 + $0x48] sm:$0xf] }
  0x20   : > { %v484_v10 = vsel %vm2873_vm5, %v479_v0, %v483_v47  ;;  %v2301_v11 = vcombine.low %v1027_v60, %v1030_v6  ;;  %v497_v13 = vrot.slane %v495_v2, 5  ;;  %v501_v14 = vrot.slane %v499_v3, 4  ;;  %v267_v60 = vld [vmem:[%s2847_s8 + $0x38] sm:$0x1]  ;;  %v2973_v3 = vld [vmem:[%s2847_s8 + $0x40] sm:$0xf] }
  0x21   : > { %v2265_v16 = vcombine.low %v474_v5, %v484_v10  ;;  %v492_v17 = vor.u32 %v491_v7, %v488_v1  ;;  %v507_v19 = vrot.slane %v505_v8, 5  ;;  %v510_v20 = vshrl.u32 %v2912_v4, 16  ;;  %v2736_v5 = vld [vmem:[%s3650_s1 + $0x58] sm:$0xff]   ;;  %v3000_v46 = vld [vmem:[%s2847_s8 + $0x4c] sm:$0xf] }
  0x22   : > { %1199 = vrot.lane.b32.xlu1 %v2301_v11, %s2778_s17  ;;  %v502_v21 = vor.u32 %v501_v14, %v497_v13  ;;  %v513_v22 = vshll.u32 %v2912_v4, 16  ;;  %v519_v23 = vshll.u32 %v2920_v9, 16  ;;  %v523_v24 = vshrl.u32 %v2920_v9, 16  ;;  %2508 = vmatprep.subr.bf16.mxu1 %v2736_v5 }
  0x23   : > { %925 = vrot.lane.b32.xlu0 %v2265_v16, %s2779_s24  ;;  %v493_v26 = vrot.slane %v492_v17, 4  ;;  %v512_v27 = vrot.slane %v510_v20, 4  ;;  %v529_v28 = vshll.u32 %v264_v15, 16  ;;  %v2284_v29 = vrot.slane %v2884_v43, 9  ;;  %2509 = vmatpush3.bf16.msra.mxu1 %v2736_v5 }
  0x24   : > { %v503_v30 = vrot.slane %v502_v21, 4  ;;  %v515_v31 = vrot.slane %v513_v22, 5  ;;  %v521_v32 = vrot.slane %v519_v23, 5  ;;  %v525_v34 = vrot.slane %v523_v24, 4 }
  0x25   : > { %v498_v35 = vsel %vm2873_vm5, %v493_v26, %v497_v13  ;;  %v531_v36 = vrot.slane %v529_v28, 5  ;;  %v1033_v37 = vrot.slane %v2896_v53, 5  ;;  %v1036_v38 = vrot.slane %v2899_v57, 5 }
  0x26   : > { %v508_v41 = vsel %vm2873_vm5, %v503_v30, %v507_v19  ;;  %v516_v42 = vor.u32 %v515_v31, %v512_v27  ;;  %v526_v44 = vor.u32 %v525_v34, %v521_v32  ;;  %v2285_v45 = vrot.slane %v2912_v4, 9 }
  0x27   : > { %v2266_v47 = vcombine.low %v498_v35, %v508_v41  ;;  %v1034_v48 = vsel %vm2856_vm4, %v2284_v29, %v1033_v37  ;;  %v1035_v49 = vrot.slane %v1033_v37, 4  ;;  %v1040_v50 = vrot.slane %v2920_v9, 5 }
  0x28   : > { %v517_v51 = vrot.slane %v516_v42, 4  ;;  %v527_v52 = vrot.slane %v526_v44, 4  ;;  %v1043_v54 = vrot.slane %v264_v15, 5  ;;  %v534_v56 = vshrl.u32 %v2940_v39, 16  ;;  %v270_v15 = vld [vmem:[%s2847_s8 + $0x44] sm:$0x1] }
  0x29   : > { %927 = vrot.lane.b32.xlu0 %v2266_v47, %s2779_s24  ;;  %v1037_v57 = vsel %vm2856_vm4, %v1035_v49, %v1036_v38  ;;  %v1041_v58 = vsel %vm2856_vm4, %v2285_v45, %v1040_v50  ;;  %v1042_v59 = vrot.slane %v1040_v50, 4  ;;  %v537_v61 = vshll.u32 %v2940_v39, 16  ;;  %v3003_v47 = vld [vmem:[%s2847_s8 + $0x50] sm:$0x1] }
  0x2a   : > { %v522_v63 = vsel %vm2873_vm5, %v517_v51, %v521_v32  ;;  %v532_v0 = vsel %vm2873_vm5, %v527_v52, %v531_v36  ;;  %v2302_v1 = vcombine.low %v1034_v48, %v1037_v57  ;;  %v536_v2 = vrot.slane %v534_v56, 4 }
  0x2b   : > { %v2267_v6 = vcombine.low %v522_v63, %v532_v0  ;;  %v1044_v7 = vsel %vm2856_vm4, %v1042_v59, %v1043_v54  ;;  %v539_v8 = vrot.slane %v537_v61, 5  ;;  %v543_v10 = vshll.u32 %v2955_v55, 16  ;;  %v3017_v63 = vld [vmem:[%s2847_s8 + $0x54] sm:$0xf] }
  0x2c   : > { %v2303_v11 = vcombine.low %v1041_v58, %v1044_v7  ;;  %v547_v13 = vshrl.u32 %v2955_v55, 16  ;;  %v553_v14 = vshll.u32 %v267_v60, 16  ;;  %v558_v16 = vshrl.u32 %v2966_v62, 16 }
  0x2d   : > { %929 = vrot.lane.b32.xlu1 %v2267_v6, %s2779_s24  ;;  %1201 = vrot.lane.b32.xlu0 %v2302_v1, %s2778_s17  ;;  %v540_v17 = vor.u32 %v539_v8, %v536_v2  ;;  %v545_v19 = vrot.slane %v543_v10, 5  ;;  %v561_v20 = vshll.u32 %v2966_v62, 16  ;;  %v567_v21 = vshll.u32 %v2973_v3, 16 }
  0x2e   : > { %v549_v22 = vrot.slane %v547_v13, 4  ;;  %v555_v23 = vrot.slane %v553_v14, 5  ;;  %v560_v24 = vrot.slane %v558_v16, 4  ;;  %v571_v25 = vshrl.u32 %v2973_v3, 16 }
  0x2f   : > { %v541_v26 = vrot.slane %v540_v17, 4  ;;  %v563_v27 = vrot.slane %v561_v20, 5  ;;  %v569_v28 = vrot.slane %v567_v21, 5  ;;  %v577_v29 = vshll.u32 %v270_v15, 16 }
  0x30   : > { %v550_v30 = vor.u32 %v549_v22, %v545_v19  ;;  %v573_v31 = vrot.slane %v571_v25, 4  ;;  %v2286_v32 = vrot.slane %v2940_v39, 9  ;;  %v1047_v34 = vrot.slane %v2955_v55, 5 }
  0x31   : > { %1203 = vrot.lane.b32.xlu1 %v2303_v11, %s2778_s17  ;;  %v546_v35 = vsel %vm2873_vm5, %v541_v26, %v545_v19  ;;  %v564_v36 = vor.u32 %v563_v27, %v560_v24  ;;  %v579_v37 = vrot.slane %v577_v29, 5  ;;  %v1050_v38 = vrot.slane %v267_v60, 5  ;;  %v3027_v11 = vld [vmem:[%s2847_s8 + $0x58] sm:$0xf] }
  0x32   : > { %v551_v41 = vrot.slane %v550_v30, 4  ;;  %v574_v42 = vor.u32 %v573_v31, %v569_v28  ;;  %v1048_v44 = vsel %vm2856_vm4, %v2286_v32, %v1047_v34  ;;  %v1049_v45 = vrot.slane %v1047_v34, 4 }
  0x33   : > { %v565_v48 = vrot.slane %v564_v36, 4  ;;  %v2287_v49 = vrot.slane %v2966_v62, 9  ;;  %v1054_v50 = vrot.slane %v2973_v3, 5  ;;  %v1057_v51 = vrot.slane %v270_v15, 5  ;;  %v276_v15 = vld [vmem:[%s2847_s8 + $0x5c] sm:$0x1] }
  0x34   : > { %v556_v52 = vsel %vm2873_vm5, %v551_v41, %v555_v23  ;;  %v575_v54 = vrot.slane %v574_v42, 4  ;;  %v1051_v56 = vsel %vm2856_vm4, %v1049_v45, %v1050_v38  ;;  %v582_v57 = vshrl.u32 %v2995_v40, 16  ;;  %v3043_v42 = vld [vmem:[%s2847_s8 + $0x60] sm:$0xf] }
  0x35   : > { %v2268_v58 = vcombine.low %v546_v35, %v556_v52  ;;  %v570_v59 = vsel %vm2873_vm5, %v565_v48, %v569_v28  ;;  %v2304_v60 = vcombine.low %v1048_v44, %v1051_v56  ;;  %v1055_v61 = vsel %vm2856_vm4, %v2287_v49, %v1054_v50  ;;  %v3046_v44 = vld [vmem:[%s2847_s8 + $0x64] sm:$0xf]  ;;  %v3056_v52 = vld [vmem:[%s2847_s8 + $0x6c] sm:$0xf] }
  0x36   : > { %v580_v0 = vsel %vm2873_vm5, %v575_v54, %v579_v37  ;;  %v1056_v1 = vrot.slane %v1054_v50, 4  ;;  %v584_v2 = vrot.slane %v582_v57, 4  ;;  %v585_v5 = vshll.u32 %v2995_v40, 16 }
  0x37   : > { %931 = vrot.lane.b32.xlu0 %v2268_v58, %s2779_s24  ;;  %v2269_v6 = vcombine.low %v570_v59, %v580_v0  ;;  %v591_v7 = vshll.u32 %v3000_v46, 16  ;;  %v595_v8 = vshrl.u32 %v3000_v46, 16  ;;  %v601_v10 = vshll.u32 %v3003_v47, 16 }
  0x38   : > { %v1058_v13 = vsel %vm2856_vm4, %v1056_v1, %v1057_v51  ;;  %v587_v14 = vrot.slane %v585_v5, 5  ;;  %v606_v16 = vshrl.u32 %v3017_v63, 16  ;;  %v609_v17 = vshll.u32 %v3017_v63, 16  ;;  %v3053_v51 = vld [vmem:[%s2847_s8 + $0x68] sm:$0x1] }
  0x39   : > { %933 = vrot.lane.b32.xlu1 %v2269_v6, %s2779_s24  ;;  %v2305_v19 = vcombine.low %v1055_v61, %v1058_v13  ;;  %v593_v20 = vrot.slane %v591_v7, 5  ;;  %v597_v21 = vrot.slane %v595_v8, 4  ;;  %v603_v22 = vrot.slane %v601_v10, 5  ;;  %v3069_v6 = vld [vmem:[%s2847_s8 + $0x70] sm:$0xf] }
  0x3a   : > { %v588_v23 = vor.u32 %v587_v14, %v584_v2  ;;  %v608_v24 = vrot.slane %v606_v16, 4  ;;  %v611_v25 = vrot.slane %v609_v17, 5  ;;  %v615_v26 = vshll.u32 %v3027_v11, 16  ;;  %v282_v14 = vld [vmem:[%s2847_s8 + $0x74] sm:$0x1] }
  0x3b   : > { %1205 = vrot.lane.b32.xlu0 %v2304_v60, %s2778_s17  ;;  %v598_v27 = vor.u32 %v597_v21, %v593_v20  ;;  %v619_v28 = vshrl.u32 %v3027_v11, 16  ;;  %v625_v29 = vshll.u32 %v276_v15, 16  ;;  %v2288_v30 = vrot.slane %v2995_v40, 9 }
  0x3c   : > { %v589_v31 = vrot.slane %v588_v23, 4  ;;  %v612_v32 = vor.u32 %v611_v25, %v608_v24  ;;  %v617_v34 = vrot.slane %v615_v26, 5  ;;  %v1061_v35 = vrot.slane %v3000_v46, 5 }
  0x3d   : > { %1207 = vrot.lane.b32.xlu1 %v2305_v19, %s2778_s17  ;;  %v599_v36 = vrot.slane %v598_v27, 4  ;;  %v621_v37 = vrot.slane %v619_v28, 4  ;;  %v627_v38 = vrot.slane %v625_v29, 5  ;;  %v1064_v41 = vrot.slane %v3003_v47, 5 }
  0x3e   : > { %v594_v45 = vsel %vm2873_vm5, %v589_v31, %v593_v20  ;;  %v613_v48 = vrot.slane %v612_v32, 4  ;;  %v1062_v49 = vsel %vm2856_vm4, %v2288_v30, %v1061_v35  ;;  %v1063_v50 = vrot.slane %v1061_v35, 4 }
  0x3f   : > { %v604_v47 = vsel %vm2873_vm5, %v599_v36, %v603_v22  ;;  %v622_v54 = vor.u32 %v621_v37, %v617_v34  ;;  %v2289_v56 = vrot.slane %v3017_v63, 9  ;;  %v1068_v57 = vrot.slane %v3027_v11, 5 }
  0x40   : > { %v2270_v58 = vcombine.low %v594_v45, %v604_v47  ;;  %v618_v59 = vsel %vm2873_vm5, %v613_v48, %v617_v34  ;;  %v1065_v60 = vsel %vm2856_vm4, %v1063_v50, %v1064_v41  ;;  %v1071_v61 = vrot.slane %v276_v15, 5 }
  0x41   : > { %v623_v0 = vrot.slane %v622_v54, 4  ;;  %v2306_v1 = vcombine.low %v1062_v49, %v1065_v60  ;;  %v1069_v2 = vsel %vm2856_vm4, %v2289_v56, %v1068_v57  ;;  %v1070_v5 = vrot.slane %v1068_v57, 4 }
  0x42   : > { %935 = vrot.lane.b32.xlu0 %v2270_v58, %s2779_s24  ;;  %v630_v7 = vshrl.u32 %v3043_v42, 16  ;;  %v633_v8 = vshll.u32 %v3043_v42, 16  ;;  %v639_v10 = vshll.u32 %v3046_v44, 16  ;;  %v643_v13 = vshrl.u32 %v3046_v44, 16 }
  0x43   : > { %v628_v15 = vsel %vm2873_vm5, %v623_v0, %v627_v38  ;;  %v1072_v16 = vsel %vm2856_vm4, %v1070_v5, %v1071_v61  ;;  %v649_v17 = vshll.u32 %v3053_v51, 16  ;;  %v654_v19 = vshrl.u32 %v3056_v52, 16 }
  0x44   : > { %v2271_v20 = vcombine.low %v618_v59, %v628_v15  ;;  %v2307_v21 = vcombine.low %v1069_v2, %v1072_v16  ;;  %v632_v22 = vrot.slane %v630_v7, 4  ;;  %v635_v23 = vrot.slane %v633_v8, 5  ;;  %v3097_v59 = vld [vmem:[%s2847_s8 + $0x78] sm:$0xf]  ;;  %v3104_v2 = vld [vmem:[%s2847_s8 + $0x7c] sm:$0xf] }
  0x45   : > { %v641_v24 = vrot.slane %v639_v10, 5  ;;  %v645_v25 = vrot.slane %v643_v13, 4  ;;  %v651_v26 = vrot.slane %v649_v17, 5  ;;  %v656_v27 = vrot.slane %v654_v19, 4  ;;  %v285_v16 = vld [vmem:[%s2847_s8 + $0x80] sm:$0x1] }
  0x46   : > { %937 = vrot.lane.b32.xlu1 %v2271_v20, %s2779_s24  ;;  %1209 = vrot.lane.b32.xlu0 %v2306_v1, %s2778_s17  ;;  %v636_v28 = vor.u32 %v635_v23, %v632_v22  ;;  %v657_v29 = vshll.u32 %v3056_v52, 16  ;;  %v663_v30 = vshll.u32 %v3069_v6, 16  ;;  %v667_v31 = vshrl.u32 %v3069_v6, 16  ;;  %v3120_v22 = vld [vmem:[%s2847_s8 + $0x84] sm:$0xf] }
  0x47   : > { %v646_v32 = vor.u32 %v645_v25, %v641_v24  ;;  %v673_v34 = vshll.u32 %v282_v14, 16  ;;  %v2290_v35 = vrot.slane %v3043_v42, 9  ;;  %v1075_v36 = vrot.slane %v3046_v44, 5  ;;  %v3123_v23 = vld [vmem:[%s2847_s8 + $0x88] sm:$0xf] }
  0x48   : > { %v637_v37 = vrot.slane %v636_v28, 4  ;;  %v659_v38 = vrot.slane %v657_v29, 5  ;;  %v665_v41 = vrot.slane %v663_v30, 5  ;;  %v669_v45 = vrot.slane %v667_v31, 4  ;;  %v288_v28 = vld [vmem:[%s2847_s8 + $0x8c] sm:$0x1] }
  0x49   : > { %v647_v48 = vrot.slane %v646_v32, 4  ;;  %v675_v49 = vrot.slane %v673_v34, 5  ;;  %v1076_v50 = vsel %vm2856_vm4, %v2290_v35, %v1075_v36  ;;  %v1077_v47 = vrot.slane %v1075_v36, 4 }
  0x4a   : > { %1211 = vrot.lane.b32.xlu1 %v2307_v21, %s2778_s17  ;;  %v642_v54 = vsel %vm2873_vm5, %v637_v37, %v641_v24  ;;  %v660_v56 = vor.u32 %v659_v38, %v656_v27  ;;  %v670_v57 = vor.u32 %v669_v45, %v665_v41  ;;  %v1078_v58 = vrot.slane %v3053_v51, 5 }
  0x4b   : > { %v652_v60 = vsel %vm2873_vm5, %v647_v48, %v651_v26  ;;  %v2291_v61 = vrot.slane %v3056_v52, 9  ;;  %v1082_v0 = vrot.slane %v3069_v6, 5  ;;  %v1085_v1 = vrot.slane %v282_v14, 5 }
  0x4c   : > { %v2272_v5 = vcombine.low %v642_v54, %v652_v60  ;;  %v661_v7 = vrot.slane %v660_v56, 4  ;;  %v671_v8 = vrot.slane %v670_v57, 4  ;;  %v1079_v51 = vsel %vm2856_vm4, %v1077_v47, %v1078_v58 }
  0x4d   : > { %v2308_v10 = vcombine.low %v1076_v50, %v1079_v51  ;;  %v1083_v13 = vsel %vm2856_vm4, %v2291_v61, %v1082_v0  ;;  %v1084_v15 = vrot.slane %v1082_v0, 4  ;;  %v678_v17 = vshrl.u32 %v3097_v59, 16 }
  0x4e   : > { %939 = vrot.lane.b32.xlu0 %v2272_v5, %s2779_s24  ;;  %v666_v14 = vsel %vm2873_vm5, %v661_v7, %v665_v41  ;;  %v676_v19 = vsel %vm2873_vm5, %v671_v8, %v675_v49  ;;  %v681_v20 = vshll.u32 %v3097_v59, 16  ;;  %v687_v21 = vshll.u32 %v3104_v2, 16 }
  0x4f   : > { %v2273_v24 = vcombine.low %v666_v14, %v676_v19  ;;  %v1086_v25 = vsel %vm2856_vm4, %v1084_v15, %v1085_v1  ;;  %v680_v26 = vrot.slane %v678_v17, 4  ;;  %v691_v27 = vshrl.u32 %v3104_v2, 16 }
  0x50   : > { %v2309_v29 = vcombine.low %v1083_v13, %v1086_v25  ;;  %v683_v30 = vrot.slane %v681_v20, 5  ;;  %v689_v31 = vrot.slane %v687_v21, 5  ;;  %v697_v32 = vshll.u32 %v285_v16, 16  ;;  %v3143_v13 = vld [vmem:[%s2847_s8 + $0x90] sm:$0xf] }
  0x51   : > { %941 = vrot.lane.b32.xlu1 %v2273_v24, %s2779_s24  ;;  %v693_v34 = vrot.slane %v691_v27, 4  ;;  %v702_v35 = vshrl.u32 %v3120_v22, 16  ;;  %v705_v36 = vshll.u32 %v3120_v22, 16  ;;  %v711_v37 = vshll.u32 %v3123_v23, 16 }
  0x52   : > { %1213 = vrot.lane.b32.xlu0 %v2308_v10, %s2778_s17  ;;  %v684_v38 = vor.u32 %v683_v30, %v680_v26  ;;  %v699_v41 = vrot.slane %v697_v32, 5  ;;  %v715_v45 = vshrl.u32 %v3123_v23, 16  ;;  %v721_v48 = vshll.u32 %v288_v28, 16  ;;  %v291_v30 = vld [vmem:[%s2847_s8 + $0x98] sm:$0x1] }
  0x53   : > { %v694_v49 = vor.u32 %v693_v34, %v689_v31  ;;  %v704_v50 = vrot.slane %v702_v35, 4  ;;  %v707_v47 = vrot.slane %v705_v36, 5  ;;  %v713_v54 = vrot.slane %v711_v37, 5  ;;  %v3166_v37 = vld [vmem:[%s2847_s8 + $0x9c] sm:$0xf] }
  0x54   : > { %v685_v56 = vrot.slane %v684_v38, 4  ;;  %v717_v57 = vrot.slane %v715_v45, 4  ;;  %v723_v58 = vrot.slane %v721_v48, 5  ;;  %v2292_v60 = vrot.slane %v3097_v59, 9  ;;  %v3169_v38 = vld [vmem:[%s2847_s8 + $0xa0] sm:$0xf] }
  0x55   : > { %1215 = vrot.lane.b32.xlu1 %v2309_v29, %s2778_s17  ;;  %v695_v61 = vrot.slane %v694_v49, 4  ;;  %v708_v0 = vor.u32 %v707_v47, %v704_v50  ;;  %v1089_v1 = vrot.slane %v3104_v2, 5  ;;  %v1092_v5 = vrot.slane %v285_v16, 5  ;;  %v3150_v16 = vld [vmem:[%s2847_s8 + $0x94] sm:$0xf] }
  0x56   : > { %v690_v7 = vsel %vm2873_vm5, %v685_v56, %v689_v31  ;;  %v718_v8 = vor.u32 %v717_v57, %v713_v54  ;;  %v2293_v51 = vrot.slane %v3120_v22, 9  ;;  %v1096_v10 = vrot.slane %v3123_v23, 5  ;;  %v294_v49 = vld [vmem:[%s2847_s8 + $0xa4] sm:$0x1] }
  0x57   : > { %v700_v15 = vsel %vm2873_vm5, %v695_v61, %v699_v41  ;;  %v709_v17 = vrot.slane %v708_v0, 4  ;;  %v1090_v14 = vsel %vm2856_vm4, %v2292_v60, %v1089_v1  ;;  %v1091_v19 = vrot.slane %v1089_v1, 4 }
  0x58   : > { %v2274_v20 = vcombine.low %v690_v7, %v700_v15  ;;  %v719_v21 = vrot.slane %v718_v8, 4  ;;  %v1097_v24 = vsel %vm2856_vm4, %v2293_v51, %v1096_v10  ;;  %v1098_v25 = vrot.slane %v1096_v10, 4 }
  0x59   : > { %v714_v26 = vsel %vm2873_vm5, %v709_v17, %v713_v54  ;;  %v1093_v27 = vsel %vm2856_vm4, %v1091_v19, %v1092_v5  ;;  %v1099_v29 = vrot.slane %v288_v28, 5  ;;  %v726_v31 = vshrl.u32 %v3143_v13, 16 }
  0x5a   : > { %943 = vrot.lane.b32.xlu0 %v2274_v20, %s2779_s24  ;;  %v724_v32 = vsel %vm2873_vm5, %v719_v21, %v723_v58  ;;  %v2310_v34 = vcombine.low %v1090_v14, %v1093_v27  ;;  %v729_v35 = vshll.u32 %v3143_v13, 16  ;;  %v735_v36 = vshll.u32 %v3150_v16, 16 }
  0x5b   : > { %v2275_v41 = vcombine.low %v714_v26, %v724_v32  ;;  %v1100_v28 = vsel %vm2856_vm4, %v1098_v25, %v1099_v29  ;;  %v728_v45 = vrot.slane %v726_v31, 4  ;;  %v739_v48 = vshrl.u32 %v3150_v16, 16 }
  0x5c   : > { %v2311_v50 = vcombine.low %v1097_v24, %v1100_v28  ;;  %v731_v47 = vrot.slane %v729_v35, 5  ;;  %v737_v54 = vrot.slane %v735_v36, 5  ;;  %v745_v56 = vshll.u32 %v291_v30, 16 }
  0x5d   : > { %945 = vrot.lane.b32.xlu1 %v2275_v41, %s2779_s24  ;;  %v741_v57 = vrot.slane %v739_v48, 4  ;;  %v750_v58 = vshrl.u32 %v3166_v37, 16  ;;  %v753_v60 = vshll.u32 %v3166_v37, 16  ;;  %v759_v61 = vshll.u32 %v3169_v38, 16 }
  0x5e   : > { %1217 = vrot.lane.b32.xlu0 %v2310_v34, %s2778_s17  ;;  %v732_v0 = vor.u32 %v731_v47, %v728_v45  ;;  %v747_v1 = vrot.slane %v745_v56, 5  ;;  %v763_v5 = vshrl.u32 %v3169_v38, 16  ;;  %v769_v7 = vshll.u32 %v294_v49, 16  ;;  %v3189_v34 = vld [vmem:[%s2847_s8 + $0xa8] sm:$0xf] }
  0x5f   : > { %v742_v8 = vor.u32 %v741_v57, %v737_v54  ;;  %v752_v51 = vrot.slane %v750_v58, 4  ;;  %v755_v10 = vrot.slane %v753_v60, 5  ;;  %v761_v15 = vrot.slane %v759_v61, 5  ;;  %v297_v58 = vld [vmem:[%s2847_s8 + $0xb0] sm:$0x1] }
  0x60   : > { %v733_v17 = vrot.slane %v732_v0, 4  ;;  %v765_v14 = vrot.slane %v763_v5, 4  ;;  %v771_v19 = vrot.slane %v769_v7, 5  ;;  %v2294_v20 = vrot.slane %v3143_v13, 9  ;;  %v3212_v7 = vld [vmem:[%s2847_s8 + $0xb4] sm:$0xf] }
  0x61   : > { %1219 = vrot.lane.b32.xlu1 %v2311_v50, %s2778_s17  ;;  %v743_v21 = vrot.slane %v742_v8, 4  ;;  %v756_v24 = vor.u32 %v755_v10, %v752_v51  ;;  %v1103_v25 = vrot.slane %v3150_v16, 5  ;;  %v1106_v26 = vrot.slane %v291_v30, 5  ;;  %v3196_v30 = vld [vmem:[%s2847_s8 + $0xac] sm:$0xf] }
  0x62   : > { %v738_v27 = vsel %vm2873_vm5, %v733_v17, %v737_v54  ;;  %v766_v29 = vor.u32 %v765_v14, %v761_v15  ;;  %v2295_v31 = vrot.slane %v3166_v37, 9  ;;  %v1110_v32 = vrot.slane %v3169_v38, 5  ;;  %v3215_v8 = vld [vmem:[%s2847_s8 + $0xb8] sm:$0xf]  ;;  %v300_v17 = vld [vmem:[%s2847_s8 + $0xbc] sm:$0x1] }
  0x63   : > { %v748_v35 = vsel %vm2873_vm5, %v743_v21, %v747_v1  ;;  %v757_v36 = vrot.slane %v756_v24, 4  ;;  %v1104_v41 = vsel %vm2856_vm4, %v2294_v20, %v1103_v25  ;;  %v1105_v28 = vrot.slane %v1103_v25, 4 }
  0x64   : > { %v2276_v45 = vcombine.low %v738_v27, %v748_v35  ;;  %v767_v48 = vrot.slane %v766_v29, 4  ;;  %v1111_v50 = vsel %vm2856_vm4, %v2295_v31, %v1110_v32  ;;  %v1112_v47 = vrot.slane %v1110_v32, 4 }
  0x65   : > { %v762_v54 = vsel %vm2873_vm5, %v757_v36, %v761_v15  ;;  %v1107_v56 = vsel %vm2856_vm4, %v1105_v28, %v1106_v26  ;;  %v1113_v57 = vrot.slane %v294_v49, 5  ;;  %v774_v60 = vshrl.u32 %v3189_v34, 16 }
  0x66   : > { %947 = vrot.lane.b32.xlu0 %v2276_v45, %s2779_s24  ;;  %v772_v61 = vsel %vm2873_vm5, %v767_v48, %v771_v19  ;;  %v2312_v0 = vcombine.low %v1104_v41, %v1107_v56  ;;  %v777_v1 = vshll.u32 %v3189_v34, 16  ;;  %v783_v5 = vshll.u32 %v3196_v30, 16 }
  0x67   : > { %v2277_v51 = vcombine.low %v762_v54, %v772_v61  ;;  %v1114_v49 = vsel %vm2856_vm4, %v1112_v47, %v1113_v57  ;;  %v776_v10 = vrot.slane %v774_v60, 4  ;;  %v787_v15 = vshrl.u32 %v3196_v30, 16 }
  0x68   : > { %v2313_v14 = vcombine.low %v1111_v50, %v1114_v49  ;;  %v779_v20 = vrot.slane %v777_v1, 5  ;;  %v785_v19 = vrot.slane %v783_v5, 5  ;;  %v793_v21 = vshll.u32 %v297_v58, 16 }
  0x69   : > { %949 = vrot.lane.b32.xlu1 %v2277_v51, %s2779_s24  ;;  %v789_v24 = vrot.slane %v787_v15, 4  ;;  %v798_v25 = vshrl.u32 %v3212_v7, 16  ;;  %v801_v26 = vshll.u32 %v3212_v7, 16  ;;  %v807_v27 = vshll.u32 %v3215_v8, 16 }
  0x6a   : > { %1221 = vrot.lane.b32.xlu0 %v2312_v0, %s2778_s17  ;;  %v780_v29 = vor.u32 %v779_v20, %v776_v10  ;;  %v795_v31 = vrot.slane %v793_v21, 5  ;;  %v811_v32 = vshrl.u32 %v3215_v8, 16  ;;  %v817_v35 = vshll.u32 %v300_v17, 16 }
  0x6b   : > { %v790_v36 = vor.u32 %v789_v24, %v785_v19  ;;  %v800_v41 = vrot.slane %v798_v25, 4  ;;  %v803_v28 = vrot.slane %v801_v26, 5  ;;  %v809_v45 = vrot.slane %v807_v27, 5  ;;  %v3244_v25 = vld [vmem:[%s2847_s8 + $0xc4] sm:$0xf] }
  0x6c   : > { %v781_v48 = vrot.slane %v780_v29, 4  ;;  %v813_v50 = vrot.slane %v811_v32, 4  ;;  %v819_v47 = vrot.slane %v817_v35, 5  ;;  %v2296_v54 = vrot.slane %v3189_v34, 9  ;;  %v2751_v32 = vld [vmem:[%s2847_s8 + $0x4] sm:$0xf] }
  0x6d   : > { %1223 = vrot.lane.b32.xlu1 %v2313_v14, %s2778_s17  ;;  %v791_v56 = vrot.slane %v790_v36, 4  ;;  %v804_v57 = vor.u32 %v803_v28, %v800_v41  ;;  %v1117_v60 = vrot.slane %v3196_v30, 5  ;;  %v1120_v61 = vrot.slane %v297_v58, 5  ;;  %v3239_v58 = vld [vmem:[%s2847_s8 + $0xc0] sm:$0xf] }
  0x6e   : > { %v786_v0 = vsel %vm2873_vm5, %v781_v48, %v785_v19  ;;  %v814_v1 = vor.u32 %v813_v50, %v809_v45  ;;  %v2297_v5 = vrot.slane %v3212_v7, 9  ;;  %v1124_v51 = vrot.slane %v3215_v8, 5  ;;  %v3253_v36 = vld [vmem:[%s2847_s8 + $0xc8] sm:$0x1]  ;;  %v2752_v48 = vld [vmem:[%s2847_s8 + $0xc] sm:$0xf] }
  0x6f   : > { %v796_v49 = vsel %vm2873_vm5, %v791_v56, %v795_v31  ;;  %v805_v10 = vrot.slane %v804_v57, 4  ;;  %v1118_v15 = vsel %vm2856_vm4, %v2296_v54, %v1117_v60  ;;  %v1119_v14 = vrot.slane %v1117_v60, 4  ;;  %v2750_v31 = vld [vmem:[%s2847_s8] sm:$0xf]  ;;  %v3262_v54 = vld [vmem:[%s2847_s8 + $0xcc] sm:$0xf] }
  0x70   : > { %v2278_v20 = vcombine.low %v786_v0, %v796_v49  ;;  %v815_v19 = vrot.slane %v814_v1, 4  ;;  %v1125_v21 = vsel %vm2856_vm4, %v2297_v5, %v1124_v51  ;;  %v1126_v24 = vrot.slane %v1124_v51, 4  ;;  %v306_v5 = vld [vmem:[%s2847_s8 + $0xd4] sm:$0x1] }
  0x71   : > { %v810_v26 = vsel %vm2873_vm5, %v805_v10, %v809_v45  ;;  %v1121_v27 = vsel %vm2856_vm4, %v1119_v14, %v1120_v61  ;;  %v1127_v29 = vrot.slane %v300_v17, 5  ;;  %v2246_v35 = vcombine.low %v2750_v31, %v2751_v32 }
  0x72   : > { %951 = vrot.lane.b32.xlu0 %v2278_v20, %s2779_s24  ;;  %v820_v41 = vsel %vm2873_vm5, %v815_v19, %v819_v47  ;;  %v2314_v28 = vcombine.low %v1118_v15, %v1121_v27  ;;  %v2247_v45 = vcombine.low %v2752_v48, %v2862_v18  ;;  %v822_v50 = vshrl.u32 %v3239_v58, 16  ;;  %v3270_v47 = vld [vmem:[%s2847_s8 + $0xd0] sm:$0xf]  ;;  %s246_s8 = scalar_lea.vmem %s3654_s5, %s2413_s30 }
  0x73   : > { %v2279_v17 = vcombine.low %v810_v26, %v820_v41  ;;  %v1128_v56 = vsel %vm2856_vm4, %v1126_v24, %v1127_v29  ;;  %416 = vst.msk [vmem:[#allocation2] sm:$0xff] %vm415_vm6, %v2246_v35  ;;  %v825_v57 = vshll.u32 %v3239_v58, 16  ;;  %v831_v60 = vshll.u32 %v3244_v25, 16 }
  0x74   : > { %v2315_v61 = vcombine.low %v1125_v21, %v1128_v56  ;;  %417 = vst.msk [vmem:[#allocation2 + $0x8] sm:$0xff] %vm415_vm6, %v2247_v45  ;;  %v824_v18 = vrot.slane %v822_v50, 4  ;;  %v835_v0 = vshrl.u32 %v3244_v25, 16  ;;  %v841_v1 = vshll.u32 %v3253_v36, 16 }
  0x75   : > { %953 = vrot.lane.b32.xlu1 %v2279_v17, %s2779_s24  ;;  %v827_v51 = vrot.slane %v825_v57, 5  ;;  %v833_v49 = vrot.slane %v831_v60, 5  ;;  %v846_v10 = vshrl.u32 %v3262_v54, 16  ;;  %v849_v15 = vshll.u32 %v3262_v54, 16 }
  0x76   : > { %1225 = vrot.lane.b32.xlu0 %v2314_v28, %s2778_s17  ;;  %v837_v14 = vrot.slane %v835_v0, 4  ;;  %v843_v20 = vrot.slane %v841_v1, 5  ;;  %v855_v19 = vshll.u32 %v3270_v47, 16  ;;  %v859_v21 = vshrl.u32 %v3270_v47, 16 }
  0x77   : > { %v828_v24 = vor.u32 %v827_v51, %v824_v18  ;;  %v848_v26 = vrot.slane %v846_v10, 4  ;;  %v851_v27 = vrot.slane %v849_v15, 5  ;;  %v865_v29 = vshll.u32 %v306_v5, 16 }
  0x78   : > { %v838_v31 = vor.u32 %v837_v14, %v833_v49  ;;  %v857_v32 = vrot.slane %v855_v19, 5  ;;  %v861_v35 = vrot.slane %v859_v21, 4  ;;  %v2248_v41 = vcombine.low %v2884_v43, %v2896_v53 }
  0x79   : > { %1227 = vrot.lane.b32.xlu1 %v2315_v61, %s2778_s17  ;;  %v829_v48 = vrot.slane %v828_v24, 4  ;;  %v852_v28 = vor.u32 %v851_v27, %v848_v26  ;;  %v867_v45 = vrot.slane %v865_v29, 5  ;;  %v2249_v50 = vcombine.low %v2912_v4, %v2920_v9 }
  0x7a   : > { %v839_v17 = vrot.slane %v838_v31, 4  ;;  %v862_v56 = vor.u32 %v861_v35, %v857_v32  ;;  %418 = vst.msk [vmem:[#allocation2 + $0x10] sm:$0xff] %vm415_vm6, %v2248_v41  ;;  %v2298_v57 = vrot.slane %v3239_v58, 9  ;;  %v1131_v60 = vrot.slane %v3244_v25, 5  ;;  %v2741_v35 = vld [vmem:[%s3650_s1 + $0x88] sm:$0xff]  }
  0x7b   : > { %v834_v18 = vsel %vm2873_vm5, %v829_v48, %v833_v49  ;;  %v853_v43 = vrot.slane %v852_v28, 4  ;;  %419 = vst.msk [vmem:[#allocation2 + $0x18] sm:$0xff] %vm415_vm6, %v2249_v50  ;;  %v1134_v53 = vrot.slane %v3253_v36, 5  ;;  %v2299_v10 = vrot.slane %v3262_v54, 9 }
  0x7c   : > { %v844_v61 = vsel %vm2873_vm5, %v839_v17, %v843_v20  ;;  %v863_v4 = vrot.slane %v862_v56, 4  ;;  %v1132_v9 = vsel %vm2856_vm4, %v2298_v57, %v1131_v60  ;;  %v1133_v0 = vrot.slane %v1131_v60, 4 }
  0x7d   : > { %v2280_v1 = vcombine.low %v834_v18, %v844_v61  ;;  %v858_v51 = vsel %vm2873_vm5, %v853_v43, %v857_v32  ;;  %v1138_v49 = vrot.slane %v3270_v47, 5  ;;  %v1141_v14 = vrot.slane %v306_v5, 5 }
  0x7e   : > { %v868_v15 = vsel %vm2873_vm5, %v863_v4, %v867_v45  ;;  %v1135_v36 = vsel %vm2856_vm4, %v1133_v0, %v1134_v53  ;;  %v2250_v20 = vcombine.low %v2940_v39, %v2955_v55  ;;  %v2251_v33 = vcombine.low %v2966_v62, %v2973_v3 }
  0x7f   : > { %955 = vrot.lane.b32.xlu0 %v2280_v1, %s2779_s24  ;;  %v2281_v19 = vcombine.low %v858_v51, %v868_v15  ;;  %v2316_v21 = vcombine.low %v1132_v9, %v1135_v36  ;;  %v1139_v24 = vsel %vm2856_vm4, %v2299_v10, %v1138_v49  ;;  %v1140_v26 = vrot.slane %v1138_v49, 4 }
  0x80   : > { %420 = vst.msk [vmem:[#allocation2 + $0x20] sm:$0xff] %vm415_vm6, %v2250_v20  ;;  %v2252_v27 = vcombine.low %v2995_v40, %v3000_v46  ;;  %v2253_v5 = vcombine.low %v3017_v63, %v3027_v11  ;;  %v2254_v39 = vcombine.low %v3043_v42, %v3046_v44  ;;  %v2255_v29 = vcombine.low %v3056_v52, %v3069_v6 }
  0x81   : > { %957 = vrot.lane.b32.xlu1 %v2281_v19, %s2779_s24  ;;  %v1142_v55 = vsel %vm2856_vm4, %v1140_v26, %v1141_v14  ;;  %v2256_v62 = vcombine.low %v3097_v59, %v3104_v2  ;;  %v2257_v3 = vcombine.low %v3120_v22, %v3123_v23  ;;  %421 = vst.msk [vmem:[#allocation2 + $0x28] sm:$0xff] %vm415_vm6, %v2251_v33  ;;  %v2737_v22 = vld [vmem:[%s3650_s1 + $0x68] sm:$0xff]  }
  0x82   : > { %v2317_v40 = vcombine.low %v1139_v24, %v1142_v55  ;;  %422 = vst.msk [vmem:[#allocation2 + $0x30] sm:$0xff] %vm415_vm6, %v2252_v27  ;;  %423 = vst.msk [vmem:[#allocation2 + $0x38] sm:$0xff] %vm415_vm6, %v2253_v5  ;;  %v2258_v12 = vcombine.low %v3143_v13, %v3150_v16  ;;  %v2259_v46 = vcombine.low %v3166_v37, %v3169_v38  ;;  %v2753_v37 = vld [vmem:[%s3650_s1 + $0x60] sm:$0xff]   ;;  %v2738_v38 = vld [vmem:[%s3650_s1 + $0x70] sm:$0xff]  }
  0x83   : > { %424 = vst.msk [vmem:[#allocation2 + $0x40] sm:$0xff] %vm415_vm6, %v2254_v39  ;;  %v2260_v63 = vcombine.low %v3189_v34, %v3196_v30  ;;  %1229 = vrot.lane.b32.xlu0 %v2316_v21, %s2778_s17  ;;  %425 = vst.msk [vmem:[#allocation2 + $0x48] sm:$0xff] %vm415_vm6, %v2255_v29  ;;  %v2261_v11 = vcombine.low %v3212_v7, %v3215_v8  ;;  %v2262_v30 = vcombine.low %v3239_v58, %v3244_v25  ;;  %v2739_v8 = vld [vmem:[%s3650_s1 + $0x78] sm:$0xff]   ;;  %v2740_v25 = vld [vmem:[%s3650_s1 + $0x80] sm:$0xff]  }
  0x84   : > { %426 = vst.msk [vmem:[#allocation2 + $0x50] sm:$0xff] %vm415_vm6, %v2256_v62  ;;  %427 = vst.msk [vmem:[#allocation2 + $0x58] sm:$0xff] %vm415_vm6, %v2257_v3  ;;  %v2263_v7 = vcombine.low %v3262_v54, %v3270_v47 }
  0x85   : > { %428 = vst.msk [vmem:[#allocation2 + $0x60] sm:$0xff] %vm415_vm6, %v2258_v12  ;;  %429 = vst.msk [vmem:[#allocation2 + $0x68] sm:$0xff] %vm415_vm6, %v2259_v46  ;;  %1231 = vrot.lane.b32.xlu1 %v2317_v40, %s2778_s17 }
  0x86   : > { %430 = vst.msk [vmem:[#allocation2 + $0x70] sm:$0xff] %vm415_vm6, %v2260_v63  ;;  %431 = vst.msk [vmem:[#allocation2 + $0x78] sm:$0xff] %vm415_vm6, %v2261_v11 }
  0x87   : > { %432 = vst.msk [vmem:[#allocation2 + $0x80] sm:$0xff] %vm415_vm6, %v2262_v30  ;;  %433 = vst.msk [vmem:[#allocation2 + $0x88] sm:$0xff] %vm415_vm6, %v2263_v7 }
  0x8d   : > { %v1198_v42 = vpop.permute.xlu1 %1197 }
  0x90   : > { %v924_v44 = vpop.permute.xlu0 %923 }
  0x91   : > { %978 = vst.msk [vmem:[#allocation2] sm:$0xff] %vm977_vm7, %v924_v44 }
  0x92   : > { %1252 = vst.msk [vmem:[#allocation2] sm:$0xff] %vm1251_vm8, %v1198_v42 }
  0x94   : > { %v1200_v52 = vpop.permute.xlu1 %1199 }
  0x95   : > { %v926_v6 = vpop.permute.xlu0 %925 }
  0x96   : > { %979 = vst.msk [vmem:[#allocation2 + $0x8] sm:$0xff] %vm977_vm7, %v926_v6 }
  0x97   : > { %1253 = vst.msk [vmem:[#allocation2 + $0x8] sm:$0xff] %vm1251_vm8, %v1200_v52 }
  0x99   : > { %v1270_v59 = vld [vmem:[#allocation2] sm:$0xff] }
  0x9a   : > { %2554 = vmatprep.mubr.msk.bf16.mxu0 %vm1349_vm9, %v1270_v59 }
  0x9b   : > { %v928_v2 = vpop.permute.xlu0 %927 }
  0x9c   : > { %980 = vst.msk [vmem:[#allocation2 + $0x10] sm:$0xff] %vm977_vm7, %v928_v2 }
  0x9e   : > { %v1271_v23 = vld [vmem:[#allocation2 + $0x8] sm:$0xff] }
  0x9f   : > { %v930_v13 = vpop.permute.xlu1 %929  ;;  %v1202_v16 = vpop.permute.xlu0 %1201  ;;  %2510 = vmatprep.mubr.msk.bf16.mxu1 %vm1349_vm9, %v1271_v23  ;;  %2555 = vmatmul.mubr.msk.bf16.vlgmr.msra.gmra.mrb[0].mxu0 %vm1349_vm9, %v1271_v23 }
  0xa0   : > { %981 = vst.msk [vmem:[#allocation2 + $0x18] sm:$0xff] %vm977_vm7, %v930_v13  ;;  %2587 = vmatpush3.bf16.msra.mxu0 %v2753_v37 }
  0xa1   : > { %1254 = vst.msk [vmem:[#allocation2 + $0x10] sm:$0xff] %vm1251_vm8, %v1202_v16  ;;  %2588 = vmatprep.subr.bf16.mxu0 %v2737_v22 }
  0xa3   : > { %v1204_v34 = vpop.permute.xlu1 %1203 }
  0xa4   : > { %1255 = vst.msk [vmem:[#allocation2 + $0x18] sm:$0xff] %vm1251_vm8, %v1204_v34  ;;  %2589 = vmatpush3.bf16.msra.mxu0 %v2737_v22 }
  0xa5   : > { %2590 = vmatprep.subr.bf16.mxu0 %v2738_v38 }
  0xa8   : > { %v3377_v31 = vld [vmem:[#allocation2 + $0x10] sm:$0xff]  ;;  %2591 = vmatpush3.bf16.msra.mxu0 %v2738_v38 }
  0xa9   : > { %2511 = vmatmul.mubr.msk.bf16.vlgmr.msra.gmra.mrb[0].mxu1 %vm1349_vm9, %v3377_v31  ;;  %2558 = vmatprep.mubr.msk.bf16.mxu0 %vm1349_vm9, %v3377_v31  ;;  %v932_v58 = vpop.permute.xlu0 %931 }
  0xaa   : > { %982 = vst.msk [vmem:[#allocation2 + $0x20] sm:$0xff] %vm977_vm7, %v932_v58  ;;  %2592 = vmatprep.subr.bf16.mxu0 %v2739_v8 }
  0xab   : > { %v934_v54 = vpop.permute.xlu1 %933  ;;  %v3389_v47 = vld [vmem:[#allocation2 + $0x18] sm:$0xff] }
  0xac   : > { %983 = vst.msk [vmem:[#allocation2 + $0x28] sm:$0xff] %vm977_vm7, %v934_v54  ;;  %2514 = vmatprep.mubr.msk.bf16.mxu1 %vm1349_vm9, %v3389_v47  ;;  %2559 = vmatmul.mubr.msk.bf16.gmra.mrb[4].mxu0 %vm1349_vm9, %v3389_v47 }
  0xad   : > { %v1206_v32 = vpop.permute.xlu0 %1205  ;;  %2593 = vmatpush3.bf16.msra.mxu0 %v2739_v8 }
  0xae   : > { %1256 = vst.msk [vmem:[#allocation2 + $0x20] sm:$0xff] %vm1251_vm8, %v1206_v32  ;;  %2594 = vmatprep.subr.bf16.mxu0 %v2740_v25 }
  0xaf   : > { %v1208_v41 = vpop.permute.xlu1 %1207 }
  0xb0   : > { %1257 = vst.msk [vmem:[#allocation2 + $0x28] sm:$0xff] %vm1251_vm8, %v1208_v41  ;;  %v2092_v41 = vld [vmem:[%s3653_s4] sm:$0x3f] }
  0xb1   : > { %2595 = vmatpush3.bf16.msra.mxu0 %v2740_v25  ;;  %v3520_v25 = vld [vmem:[%s3652_s3] sm:$0x7] }
  0xb2   : > { %2596 = vmatprep.subr.bf16.mxu0 %v2741_v35 }
  0xb4   : > { %v936_v48 = vpop.permute.xlu0 %935 }
  0xb5   : > { %984 = vst.msk [vmem:[#allocation2 + $0x30] sm:$0xff] %vm977_vm7, %v936_v48  ;;  %v3402_v28 = vld [vmem:[#allocation2 + $0x20] sm:$0xff]  ;;  %2597 = vmatpush3.bf16.msra.mxu0 %v2741_v35  ;;  %v2780_v48 = vmov 0  }
  0xb6   : > { %2515 = vmatmul.mubr.msk.bf16.gmra.mrb[4].mxu1 %vm1349_vm9, %v3402_v28  ;;  %2562 = vmatprep.mubr.msk.bf16.mxu0 %vm1349_vm9, %v3402_v28 }
  0xb7   : > { %v3408_v45 = vld [vmem:[#allocation2 + $0x28] sm:$0xff]  ;;  %2722 = vset.pattern.permute.xlu0 %v2780_v48 }
  0xb8   : > { %v938_v50 = vpop.permute.xlu1 %937  ;;  %v1210_v17 = vpop.permute.xlu0 %1209  ;;  %2518 = vmatprep.mubr.msk.bf16.mxu1 %vm1349_vm9, %v3408_v45  ;;  %2563 = vmatmul.mubr.msk.bf16.gmra.mrb[8].mxu0 %vm1349_vm9, %v3408_v45 }
  0xb9   : > { %985 = vst.msk [vmem:[#allocation2 + $0x38] sm:$0xff] %vm977_vm7, %v938_v50  ;;  %2095 = vperm.xlu0 %2722, %v2092_v41  }
  0xba   : > { %1258 = vst.msk [vmem:[#allocation2 + $0x30] sm:$0xff] %vm1251_vm8, %v1210_v17 }
  0xbc   : > { %v1212_v56 = vpop.permute.xlu1 %1211 }
  0xbd   : > { %1259 = vst.msk [vmem:[#allocation2 + $0x38] sm:$0xff] %vm1251_vm8, %v1212_v56 }
  0xc0   : > { %v940_v57 = vpop.permute.xlu0 %939 }
  0xc1   : > { %v3417_v60 = vld [vmem:[#allocation2 + $0x30] sm:$0xff]  ;;  %986 = vst.msk [vmem:[#allocation2 + $0x40] sm:$0xff] %vm977_vm7, %v940_v57  ;;  %v3545_v57 = vld [vmem:[%s3651_s2] ss:$0 sm:$0xff] }
  0xc2   : > { %2519 = vmatmul.mubr.msk.bf16.gmra.mrb[8].mxu1 %vm1349_vm9, %v3417_v60  ;;  %2566 = vmatprep.mubr.msk.bf16.mxu0 %vm1349_vm9, %v3417_v60 }
  0xc3   : > { %v942_v18 = vpop.permute.xlu1 %941 }
  0xc4   : > { %987 = vst.msk [vmem:[#allocation2 + $0x48] sm:$0xff] %vm977_vm7, %v942_v18  ;;  %v1214_v43 = vpop.permute.xlu0 %1213  ;;  %v3425_v53 = vld [vmem:[#allocation2 + $0x38] sm:$0xff] }
  0xc5   : > { %1260 = vst.msk [vmem:[#allocation2 + $0x40] sm:$0xff] %vm1251_vm8, %v1214_v43  ;;  %2522 = vmatprep.mubr.msk.bf16.mxu1 %vm1349_vm9, %v3425_v53  ;;  %2567 = vmatmul.mubr.msk.bf16.gmra.mrb[12].mxu0 %vm1349_vm9, %v3425_v53 }
  0xc7   : > { %v1216_v61 = vpop.permute.xlu1 %1215 }
  0xc8   : > { %1261 = vst.msk [vmem:[#allocation2 + $0x48] sm:$0xff] %vm1251_vm8, %v1216_v61 }
  0xcc   : > { %v944_v4 = vpop.permute.xlu0 %943  ;;  %v3433_v9 = vld [vmem:[#allocation2 + $0x40] sm:$0xff] }
  0xcd   : > { %988 = vst.msk [vmem:[#allocation2 + $0x50] sm:$0xff] %vm977_vm7, %v944_v4  ;;  %2523 = vmatmul.mubr.msk.bf16.gmra.mrb[12].mxu1 %vm1349_vm9, %v3433_v9  ;;  %2570 = vmatprep.mubr.msk.bf16.mxu0 %vm1349_vm9, %v3433_v9 }
  0xcf   : > { %v946_v0 = vpop.permute.xlu1 %945  ;;  %v1279_v1 = vld [vmem:[#allocation2 + $0x48] sm:$0xff] }
  0xd0   : > { %989 = vst.msk [vmem:[#allocation2 + $0x58] sm:$0xff] %vm977_vm7, %v946_v0  ;;  %v1218_v51 = vpop.permute.xlu0 %1217  ;;  %2526 = vmatprep.mubr.msk.bf16.mxu1 %vm1349_vm9, %v1279_v1  ;;  %2571 = vmatmul.mubr.msk.bf16.gmra.mrb[16].mxu0 %vm1349_vm9, %v1279_v1 }
  0xd1   : > { %1262 = vst.msk [vmem:[#allocation2 + $0x50] sm:$0xff] %vm1251_vm8, %v1218_v51 }
  0xd3   : > { %v1220_v10 = vpop.permute.xlu1 %1219 }
  0xd4   : > { %1263 = vst.msk [vmem:[#allocation2 + $0x58] sm:$0xff] %vm1251_vm8, %v1220_v10 }
  0xd8   : > { %v948_v49 = vpop.permute.xlu0 %947  ;;  %v1280_v15 = vld [vmem:[#allocation2 + $0x50] sm:$0xff] }
  0xd9   : > { %990 = vst.msk [vmem:[#allocation2 + $0x60] sm:$0xff] %vm977_vm7, %v948_v49  ;;  %2527 = vmatmul.mubr.msk.bf16.gmra.mrb[16].mxu1 %vm1349_vm9, %v1280_v15  ;;  %2574 = vmatprep.mubr.msk.bf16.mxu0 %vm1349_vm9, %v1280_v15 }
  0xdb   : > { %v950_v36 = vpop.permute.xlu1 %949  ;;  %v1281_v14 = vld [vmem:[#allocation2 + $0x58] sm:$0xff] }
  0xdc   : > { %991 = vst.msk [vmem:[#allocation2 + $0x68] sm:$0xff] %vm977_vm7, %v950_v36  ;;  %v1222_v20 = vpop.permute.xlu0 %1221  ;;  %2530 = vmatprep.mubr.msk.bf16.mxu1 %vm1349_vm9, %v1281_v14  ;;  %2575 = vmatmul.mubr.msk.bf16.gmra.mrb[20].mxu0 %vm1349_vm9, %v1281_v14 }
  0xdd   : > { %1264 = vst.msk [vmem:[#allocation2 + $0x60] sm:$0xff] %vm1251_vm8, %v1222_v20 }
  0xdf   : > { %v1224_v19 = vpop.permute.xlu1 %1223 }
  0xe0   : > { %1265 = vst.msk [vmem:[#allocation2 + $0x68] sm:$0xff] %vm1251_vm8, %v1224_v19 }
  0xe4   : > { %v952_v21 = vpop.permute.xlu0 %951  ;;  %v1282_v24 = vld [vmem:[#allocation2 + $0x60] sm:$0xff] }
  0xe5   : > { %992 = vst.msk [vmem:[#allocation2 + $0x70] sm:$0xff] %vm977_vm7, %v952_v21  ;;  %2531 = vmatmul.mubr.msk.bf16.gmra.mrb[20].mxu1 %vm1349_vm9, %v1282_v24  ;;  %2578 = vmatprep.mubr.msk.bf16.mxu0 %vm1349_vm9, %v1282_v24 }
  0xe7   : > { %v954_v26 = vpop.permute.xlu1 %953  ;;  %v1283_v33 = vld [vmem:[#allocation2 + $0x68] sm:$0xff] }
  0xe8   : > { %993 = vst.msk [vmem:[#allocation2 + $0x78] sm:$0xff] %vm977_vm7, %v954_v26  ;;  %v1226_v27 = vpop.permute.xlu0 %1225  ;;  %2534 = vmatprep.mubr.msk.bf16.mxu1 %vm1349_vm9, %v1283_v33  ;;  %2579 = vmatmul.mubr.msk.bf16.gmra.mrb[24].mxu0 %vm1349_vm9, %v1283_v33 }
  0xe9   : > { %1266 = vst.msk [vmem:[#allocation2 + $0x70] sm:$0xff] %vm1251_vm8, %v1226_v27 }
  0xeb   : > { %v1228_v5 = vpop.permute.xlu1 %1227 }
  0xec   : > { %1267 = vst.msk [vmem:[#allocation2 + $0x78] sm:$0xff] %vm1251_vm8, %v1228_v5 }
  0xf0   : > { %v1284_v39 = vld [vmem:[#allocation2 + $0x70] sm:$0xff] }
  0xf1   : > { %2535 = vmatmul.mubr.msk.bf16.gmra.mrb[24].mxu1 %vm1349_vm9, %v1284_v39  ;;  %2582 = vmatprep.mubr.msk.bf16.mxu0 %vm1349_vm9, %v1284_v39  ;;  %v956_v55 = vpop.permute.xlu0 %955 }
  0xf2   : > { %994 = vst.msk [vmem:[#allocation2 + $0x80] sm:$0xff] %vm977_vm7, %v956_v55 }
  0xf3   : > { %v1285_v29 = vld [vmem:[#allocation2 + $0x78] sm:$0xff]  ;;  %v958_v62 = vpop.permute.xlu1 %957 }
  0xf4   : > { %2538 = vmatprep.mubr.msk.bf16.mxu1 %vm1349_vm9, %v1285_v29  ;;  %2583 = vmatmul.mubr.msk.bf16.gmra.mrb[28].mxu0 %vm1349_vm9, %v1285_v29  ;;  %995 = vst.msk [vmem:[#allocation2 + $0x88] sm:$0xff] %vm977_vm7, %v958_v62 }
  0xf5   : > { %2598 = vmatprep.mubr.msk.bf16.mxu0 %vm1349_vm9, %v3377_v31  ;;  %v1230_v3 = vpop.permute.xlu0 %1229 }
  0xf6   : > { %1268 = vst.msk [vmem:[#allocation2 + $0x80] sm:$0xff] %vm1251_vm8, %v1230_v3 }
  0xf7   : > { %v1232_v40 = vpop.permute.xlu1 %1231 }
  0xf8   : > { %1269 = vst.msk [vmem:[#allocation2 + $0x88] sm:$0xff] %vm1251_vm8, %v1232_v40 }
  0xfc   : > { %2599 = vmatmul.mubr.msk.bf16.vlgmr.msra.gmra.mrb[0].mxu0 %vm1349_vm9, %v3389_v47 }
  0xfd   : > { %2602 = vmatprep.mubr.msk.bf16.mxu0 %vm1349_vm9, %v3402_v28  ;;  %v1286_v12 = vld [vmem:[#allocation2 + $0x80] sm:$0xff] }
  0xfe   : > { %2539 = vmatmul.mubr.msk.bf16.gmra.mrb[28].mxu1 %vm1349_vm9, %v1286_v12 }
  0xff   : > { %v1287_v46 = vld [vmem:[#allocation2 + $0x88] sm:$0xff]  ;;  %2496 = vmatprep.mubr.bf16.mxu1 %v3520_v25 }
 0x104   : > { %2603 = vmatmul.mubr.msk.bf16.gmra.mrb[4].mxu0 %vm1349_vm9, %v3408_v45 }
 0x105   : > { %2606 = vmatprep.mubr.msk.bf16.mxu0 %vm1349_vm9, %v3417_v60 }
 0x10c   : > { %2607 = vmatmul.mubr.msk.bf16.gmra.mrb[8].mxu0 %vm1349_vm9, %v3425_v53 }
 0x10d   : > { %2610 = vmatprep.mubr.msk.bf16.mxu0 %vm1349_vm9, %v3433_v9 }
 0x114   : > { %2611 = vmatmul.mubr.msk.bf16.gmra.mrb[12].mxu0 %vm1349_vm9, %v1279_v1 }
 0x115   : > { %2614 = vmatprep.mubr.msk.bf16.mxu0 %vm1349_vm9, %v1280_v15 }
 0x11c   : > { %2615 = vmatmul.mubr.msk.bf16.gmra.mrb[16].mxu0 %vm1349_vm9, %v1281_v14 }
 0x11d   : > { %2618 = vmatprep.mubr.msk.bf16.mxu0 %vm1349_vm9, %v1282_v24 }
 0x124   : > { %2619 = vmatmul.mubr.msk.bf16.gmra.mrb[20].mxu0 %vm1349_vm9, %v1283_v33 }
 0x125   : > { %2622 = vmatprep.mubr.msk.bf16.mxu0 %vm1349_vm9, %v1284_v39 }
 0x12c   : > { %2623 = vmatmul.mubr.msk.bf16.gmra.mrb[24].mxu0 %vm1349_vm9, %v1285_v29 }
 0x12d   : > { %2626 = vmatprep.mubr.msk.bf16.mxu0 %vm1349_vm9, %v1286_v12 }
 0x134   : > { %2627 = vmatmul.mubr.msk.bf16.gmra.mrb[28].mxu0 %vm1349_vm9, %v1287_v46 }
 0x17c   : > { %v2512_v63 = vpop.f32.mrb[0].mxu1 }
 0x17d   : > { %v1432_v11 = vpop.f32.mrb[1].mxu1 }
 0x17e   : > { %v2513_v42 = vpop.f32.mrb[2].mxu1 }
 0x17f   : > { %v1435_v44 = vpop.f32.mrb[3].mxu1 }
 0x189   : > { %v2516_v52 = vpop.f32.mrb[4].mxu1 }
 0x18a   : > { %v1448_v6 = vpop.f32.mrb[5].mxu1 }
 0x18b   : > { %v2517_v59 = vpop.f32.mrb[6].mxu1 }
 0x18c   : > { %v1451_v2 = vpop.f32.mrb[7].mxu1 }
 0x195   : > { %v3493_v22 = vpop.f32.mrb[8].mxu1 }
 0x196   : > { %v3495_v23 = vpop.f32.mrb[9].mxu1 }
 0x197   : > { %v3497_v13 = vpop.f32.mrb[10].mxu1 }
 0x198   : > { %v3499_v16 = vpop.f32.mrb[11].mxu1 }
 0x1a0   : > { %v3501_v37 = vpop.f32.mrb[12].mxu1 }
 0x1a1   : > { %v3503_v38 = vpop.f32.mrb[13].mxu1 }
 0x1a2   : > { %v3505_v34 = vpop.f32.mrb[14].mxu1 }
 0x1a3   : > { %v3507_v30 = vpop.f32.mrb[15].mxu1 }
 0x1ac   : > { %v3509_v7 = vpop.f32.mrb[16].mxu1 }
 0x1ad   : > { %v3511_v8 = vpop.f32.mrb[17].mxu1 }
 0x1ae   : > { %v3513_v31 = vpop.f32.mrb[18].mxu1 }
 0x1af   : > { %v3515_v58 = vpop.f32.mrb[19].mxu1 }
 0x1b8   : > { %v3523_v54 = vpop.f32.mrb[20].mxu1 }
 0x1b9   : > { %v3525_v47 = vpop.f32.mrb[21].mxu1 }
 0x1ba   : > { %v3527_v32 = vpop.f32.mrb[22].mxu1 }
 0x1bb   : > { %v3529_v35 = vpop.f32.mrb[23].mxu1 }
 0x1c4   : > { %v3534_v28 = vpop.f32.mrb[24].mxu1 }
 0x1c5   : > { %v3536_v45 = vpop.f32.mrb[25].mxu1 }
 0x1c6   : > { %v3538_v50 = vpop.f32.mrb[26].mxu1 }
 0x1c7   : > { %v3540_v17 = vpop.f32.mrb[27].mxu1 }
 0x1cf   : > { %v2600_v56 = vpop.f32.mrb[0].mxu0 }
 0x1d0   : > { %v2630_v60 = vadd.f32 %v2600_v56, %v2512_v63  ;;  %v1845_v18 = vpop.f32.mrb[1].mxu0 }
 0x1d1   : > { %v2631_v43 = vadd.f32 %v1845_v18, %v1432_v11  ;;  %v2601_v53 = vpop.f32.mrb[2].mxu0  ;;  %v3547_v61 = vpop.f32.mrb[28].mxu1 }
 0x1d2   : > { %v2013_v4 = vadd.f32 %v2630_v60, %v3545_v57  ;;  %v2632_v9 = vadd.f32 %v2601_v53, %v2513_v42  ;;  %v1848_v0 = vpop.f32.mrb[3].mxu0  ;;  %v3550_v1 = vpop.f32.mrb[29].mxu1 }
 0x1d3   : > { %v2011_v51 = vadd.f32 %v2631_v43, %v3545_v57  ;;  %v2633_v10 = vadd.f32 %v1848_v0, %v1435_v44  ;;  %v3553_v49 = vpop.f32.mrb[30].mxu1 }
 0x1d4   : > { %v2014_v15 = vadd.f32 %v2632_v9, %v3545_v57  ;;  %v3556_v36 = vpop.f32.mrb[31].mxu1  ;;  %v2045_v20 = vmax.f32 %v2013_v4, 0.0 }
 0x1d5   : > { %v2012_v14 = vadd.f32 %v2633_v10, %v3545_v57  ;;  %v2043_v21 = vmax.f32 %v2011_v51, 0.0 }
 0x1d6   : > { %v2046_v19 = vmax.f32 %v2014_v15, 0.0 }
 0x1d7   : > { %v2044_v24 = vmax.f32 %v2012_v14, 0.0  ;;  %v2604_v26 = vpop.f32.mrb[4].mxu0 }
 0x1d8   : > { %v3559_v33 = vpack.c.bf16 %v2046_v19, %v2045_v20  ;;  %v2634_v27 = vadd.f32 %v2604_v26, %v2516_v52  ;;  %v1861_v5 = vpop.f32.mrb[5].mxu0 }
 0x1d9   : > { %v3561_v39 = vpack.c.bf16 %v2044_v24, %v2043_v21  ;;  %v2635_v55 = vadd.f32 %v1861_v5, %v1448_v6  ;;  %v2605_v29 = vpop.f32.mrb[6].mxu0 }
 0x1da   : > { %v2017_v62 = vadd.f32 %v2634_v27, %v3545_v57  ;;  %v2636_v3 = vadd.f32 %v2605_v29, %v2517_v59  ;;  %v1864_v40 = vpop.f32.mrb[7].mxu0 }
 0x1db   : > { %v2015_v12 = vadd.f32 %v2635_v55, %v3545_v57  ;;  %v2637_v46 = vadd.f32 %v1864_v40, %v1451_v2 }
 0x1dc   : > { %v2018_v63 = vadd.f32 %v2636_v3, %v3545_v57  ;;  %v2049_v42 = vmax.f32 %v2017_v62, 0.0 }
 0x1dd   : > { %v2016_v11 = vadd.f32 %v2637_v46, %v3545_v57  ;;  %v2047_v41 = vmax.f32 %v2015_v12, 0.0 }
 0x1de   : > { %v2050_v44 = vmax.f32 %v2018_v63, 0.0 }
 0x1df   : > { %v2048_v52 = vmax.f32 %v2016_v11, 0.0  ;;  %v2608_v48 = vpop.f32.mrb[8].mxu0 }
 0x1e0   : > { %v3567_v56 = vpack.c.bf16 %v2050_v44, %v2049_v42  ;;  %v2638_v6 = vadd.f32 %v2608_v48, %v3493_v22  ;;  %v1877_v60 = vpop.f32.mrb[9].mxu0 }
 0x1e1   : > { %v3570_v18 = vpack.c.bf16 %v2048_v52, %v2047_v41  ;;  %v2639_v59 = vadd.f32 %v1877_v60, %v3495_v23  ;;  %v2609_v43 = vpop.f32.mrb[10].mxu0 }
 0x1e2   : > { %v2021_v2 = vadd.f32 %v2638_v6, %v3545_v57  ;;  %v2640_v53 = vadd.f32 %v2609_v43, %v3497_v13  ;;  %v1880_v4 = vpop.f32.mrb[11].mxu0 }
 0x1e3   : > { %v2019_v9 = vadd.f32 %v2639_v59, %v3545_v57  ;;  %v2641_v0 = vadd.f32 %v1880_v4, %v3499_v16 }
 0x1e4   : > { %v2022_v51 = vadd.f32 %v2640_v53, %v3545_v57  ;;  %v2053_v22 = vmax.f32 %v2021_v2, 0.0 }
 0x1e5   : > { %v2020_v10 = vadd.f32 %v2641_v0, %v3545_v57  ;;  %v2051_v14 = vmax.f32 %v2019_v9, 0.0 }
 0x1e6   : > { %v2054_v15 = vmax.f32 %v2022_v51, 0.0 }
 0x1e7   : > { %v2052_v20 = vmax.f32 %v2020_v10, 0.0  ;;  %v2612_v19 = vpop.f32.mrb[12].mxu0 }
 0x1e8   : > { %v3579_v23 = vpack.c.bf16 %v2054_v15, %v2053_v22  ;;  %v2642_v21 = vadd.f32 %v2612_v19, %v3501_v37  ;;  %v1893_v24 = vpop.f32.mrb[13].mxu0 }
 0x1e9   : > { %v3582_v13 = vpack.c.bf16 %v2052_v20, %v2051_v14  ;;  %v2643_v26 = vadd.f32 %v1893_v24, %v3503_v38  ;;  %v2613_v27 = vpop.f32.mrb[14].mxu0 }
 0x1ea   : > { %v2025_v16 = vadd.f32 %v2642_v21, %v3545_v57  ;;  %v2644_v5 = vadd.f32 %v2613_v27, %v3505_v34  ;;  %v1896_v55 = vpop.f32.mrb[15].mxu0 }
 0x1eb   : > { %v2023_v29 = vadd.f32 %v2643_v26, %v3545_v57  ;;  %v2645_v62 = vadd.f32 %v1896_v55, %v3507_v30 }
 0x1ec   : > { %v2026_v3 = vadd.f32 %v2644_v5, %v3545_v57  ;;  %v2057_v37 = vmax.f32 %v2025_v16, 0.0 }
 0x1ed   : > { %v2024_v40 = vadd.f32 %v2645_v62, %v3545_v57  ;;  %v2055_v46 = vmax.f32 %v2023_v29, 0.0 }
 0x1ee   : > { %v2058_v12 = vmax.f32 %v2026_v3, 0.0 }
 0x1ef   : > { %v2056_v63 = vmax.f32 %v2024_v40, 0.0  ;;  %v2616_v11 = vpop.f32.mrb[16].mxu0 }
 0x1f0   : > { %v3591_v38 = vpack.c.bf16 %v2058_v12, %v2057_v37  ;;  %v2646_v42 = vadd.f32 %v2616_v11, %v3509_v7  ;;  %v1909_v44 = vpop.f32.mrb[17].mxu0 }
 0x1f1   : > { %v3594_v34 = vpack.c.bf16 %v2056_v63, %v2055_v46  ;;  %v2647_v41 = vadd.f32 %v1909_v44, %v3511_v8  ;;  %v2617_v52 = vpop.f32.mrb[18].mxu0 }
 0x1f2   : > { %v2029_v30 = vadd.f32 %v2646_v42, %v3545_v57  ;;  %v2648_v48 = vadd.f32 %v2617_v52, %v3513_v31  ;;  %v1912_v6 = vpop.f32.mrb[19].mxu0 }
 0x1f3   : > { %v2027_v60 = vadd.f32 %v2647_v41, %v3545_v57  ;;  %v2649_v59 = vadd.f32 %v1912_v6, %v3515_v58 }
 0x1f4   : > { %v2030_v43 = vadd.f32 %v2648_v48, %v3545_v57  ;;  %v2061_v7 = vmax.f32 %v2029_v30, 0.0 }
 0x1f5   : > { %v2028_v2 = vadd.f32 %v2649_v59, %v3545_v57  ;;  %v2059_v4 = vmax.f32 %v2027_v60, 0.0 }
 0x1f6   : > { %v2062_v53 = vmax.f32 %v2030_v43, 0.0 }
 0x1f7   : > { %v2060_v9 = vmax.f32 %v2028_v2, 0.0  ;;  %v2620_v0 = vpop.f32.mrb[20].mxu0 }
 0x1f8   : > { %v2650_v8 = vadd.f32 %v2620_v0, %v3523_v54  ;;  %v1925_v51 = vpop.f32.mrb[21].mxu0  ;;  %v2084_v10 = vpack.c.bf16 %v2062_v53, %v2061_v7 }
 0x1f9   : > { %v2651_v31 = vadd.f32 %v1925_v51, %v3525_v47  ;;  %v2621_v22 = vpop.f32.mrb[22].mxu0  ;;  %v2083_v15 = vpack.c.bf16 %v2060_v9, %v2059_v4 }
 0x1fa   : > { %v2033_v14 = vadd.f32 %v2650_v8, %v3545_v57  ;;  %v2652_v58 = vadd.f32 %v2621_v22, %v3527_v32  ;;  %v1928_v20 = vpop.f32.mrb[23].mxu0 }
 0x1fb   : > { %v2031_v19 = vadd.f32 %v2651_v31, %v3545_v57  ;;  %v2653_v21 = vadd.f32 %v1928_v20, %v3529_v35  ;;  %2480 = vmatprep.subr.bf16.mxu1 %v2083_v15 }
 0x1fc   : > { %v2034_v24 = vadd.f32 %v2652_v58, %v3545_v57  ;;  %2481 = vmatpush3.bf16.xpose.msra.mxu1 %v3561_v39  ;;  %v2065_v47 = vmax.f32 %v2033_v14, 0.0 }
 0x1fd   : > { %v2032_v54 = vadd.f32 %v2653_v21, %v3545_v57  ;;  %2482 = vmatprep.subr.bf16.mxu1 %v2084_v10  ;;  %v2063_v27 = vmax.f32 %v2031_v19, 0.0 }
 0x1fe   : > { %v2066_v26 = vmax.f32 %v2034_v24, 0.0 }
 0x1ff   : > { %v2064_v16 = vmax.f32 %v2032_v54, 0.0  ;;  %v2624_v5 = vpop.f32.mrb[24].mxu0 }
 0x200   : > { %v2654_v32 = vadd.f32 %v2624_v5, %v3534_v28  ;;  %v1941_v55 = vpop.f32.mrb[25].mxu0  ;;  %v2086_v29 = vpack.c.bf16 %v2066_v26, %v2065_v47 }
 0x201   : > { %v2655_v62 = vadd.f32 %v1941_v55, %v3536_v45  ;;  %v2625_v35 = vpop.f32.mrb[26].mxu0  ;;  %v2085_v3 = vpack.c.bf16 %v2064_v16, %v2063_v27 }
 0x202   : > { %v2037_v40 = vadd.f32 %v2654_v32, %v3545_v57  ;;  %v2656_v39 = vadd.f32 %v2625_v35, %v3538_v50  ;;  %v1944_v37 = vpop.f32.mrb[27].mxu0 }
 0x203   : > { %v2035_v12 = vadd.f32 %v2655_v62, %v3545_v57  ;;  %v2657_v46 = vadd.f32 %v1944_v37, %v3540_v17 }
 0x204   : > { %v2038_v63 = vadd.f32 %v2656_v39, %v3545_v57  ;;  %2483 = vmatpush3.bf16.xpose.msra.mxu1 %v3559_v33  ;;  %v2069_v11 = vmax.f32 %v2037_v40, 0.0 }
 0x205   : > { %v2036_v28 = vadd.f32 %v2657_v46, %v3545_v57  ;;  %2484 = vmatprep.subr.bf16.mxu1 %v2085_v3  ;;  %v2067_v42 = vmax.f32 %v2035_v12, 0.0 }
 0x206   : > { %v2070_v45 = vmax.f32 %v2038_v63, 0.0 }
 0x207   : > { %v2068_v44 = vmax.f32 %v2036_v28, 0.0  ;;  %v2628_v41 = vpop.f32.mrb[28].mxu0 }
 0x208   : > { %v2658_v52 = vadd.f32 %v2628_v41, %v3547_v61  ;;  %v1957_v50 = vpop.f32.mrb[29].mxu0  ;;  %v2088_v30 = vpack.c.bf16 %v2070_v45, %v2069_v11 }
 0x209   : > { %v2659_v48 = vadd.f32 %v1957_v50, %v3550_v1  ;;  %v2629_v6 = vpop.f32.mrb[30].mxu0  ;;  %v2087_v17 = vpack.c.bf16 %v2068_v44, %v2067_v42 }
 0x20a   : > { %v2041_v60 = vadd.f32 %v2658_v52, %v3545_v57  ;;  %v2660_v33 = vadd.f32 %v2629_v6, %v3553_v49  ;;  %v1960_v59 = vpop.f32.mrb[31].mxu0 }
 0x20b   : > { %v2039_v43 = vadd.f32 %v2659_v48, %v3545_v57  ;;  %v2661_v2 = vadd.f32 %v1960_v59, %v3556_v36 }
 0x20c   : > { %v2042_v7 = vadd.f32 %v2660_v33, %v3545_v57  ;;  %2485 = vmatpush3.bf16.xpose.msra.mxu1 %v3570_v18  ;;  %v2073_v53 = vmax.f32 %v2041_v60, 0.0 }
 0x20d   : > { %v2040_v61 = vadd.f32 %v2661_v2, %v3545_v57  ;;  %2486 = vmatprep.subr.bf16.mxu1 %v2086_v29  ;;  %v2071_v4 = vmax.f32 %v2039_v43, 0.0  ;;  %v2096_v57 = vpop.permute.xlu0 %2095 }
 0x20e   : > { %v2074_v1 = vmax.f32 %v2042_v7, 0.0 }
 0x20f   : > { %v2072_v9 = vmax.f32 %v2040_v61, 0.0 }
 0x210   : > { %v2090_v0 = vpack.c.bf16 %v2074_v1, %v2073_v53 }
 0x211   : > { %v2089_v8 = vpack.c.bf16 %v2072_v9, %v2071_v4 }
 0x214   : > { %2487 = vmatpush3.bf16.xpose.msra.mxu1 %v3567_v56 }
 0x215   : > { %2488 = vmatprep.subr.bf16.mxu1 %v2087_v17 }
 0x21c   : > { %2489 = vmatpush3.bf16.xpose.msra.mxu1 %v3582_v13 }
 0x21d   : > { %2490 = vmatprep.subr.bf16.mxu1 %v2088_v30 }
 0x224   : > { %2491 = vmatpush3.bf16.xpose.msra.mxu1 %v3579_v23 }
 0x225   : > { %2492 = vmatprep.subr.bf16.mxu1 %v2089_v8 }
 0x22c   : > { %2493 = vmatpush3.bf16.xpose.msra.mxu1 %v3594_v34 }
 0x22d   : > { %2494 = vmatprep.subr.bf16.mxu1 %v2090_v0 }
 0x234   : > { %2495 = vmatpush3.bf16.xpose.msra.mxu1 %v3591_v38 }
 0x23b   : > { %2497 = vmatmul.mubr.bf16.vlgmr.msra.gmra.mrb[32].mxu1 %v3520_v25 }
 0x30e   : > { %v2132_v49 = vpop.f32.mrb[32].mxu1 }
 0x30f   : > { %v2133_v36 = vadd.f32 %v2132_v49, %v2096_v57  ;;  %v2134_v56 = vpop.f32.mrb[33].mxu1 }
 0x310   : > { %v2135_v18 = vadd.f32 %v2134_v56, %v2096_v57  ;;  %v2136_v13 = vpop.f32.mrb[34].mxu1 }
 0x311   : > { %v2409_v23 = vmul.f32 -1.442695, %v2133_v36  ;;  %2153 = vst [vmem:[%s246_s8] sm:$0x30] %v2133_v36  ;;  %v2137_v51 = vpop.f32.mrb[35].mxu1 }
 0x312   : > { %v2410_v34 = vmul.f32 -1.442695, %v2135_v18  ;;  %2154 = vst [vmem:[%s246_s8 + $0x8] sm:$0x30] %v2135_v18 }
 0x313   : > { %2742 = vpow2.f32 %v2409_v23 }
 0x314   : > { %2744 = vpow2.f32 %v2410_v34 }
 0x31d   : > { %v2743_v38 = vpop.eup %2742 }
 0x31e   : > { %v2745_v25 = vpop.eup %2744  ;;  %v2145_v10 = vadd.f32 1.0, %v2743_v38 }
 0x31f   : > { %v2146_v31 = vadd.f32 1.0, %v2745_v25 }
 0x320   : > { %2746 = vrcp.f32 %v2145_v10 }
 0x321   : > { %2748 = vrcp.f32 %v2146_v31 }
 0x32a   : > { %v2747_v22 = vpop.eup %2746 }
 0x32b   : > { %v2749_v15 = vpop.eup %2748  ;;  %2151 = vst [vmem:[%s246_s8] sm:$0xf] %v2747_v22 }
 0x32c   : > { %2152 = vst [vmem:[%s246_s8 + $0x8] sm:$0xf] %v2749_v15 }
 0x32d PF: > { %s15_s20 = sadd.s32 1, %s2776_s20   ;;  %s3659_s18 = smov %s2772_s19 }
 0x32e   : > { %p12_p5 = scmp.ge.s32.totalorder %s15_s20, 4   ;;  %s3660_s19 = smov %s3662_s21 }
 0x330   :  { %14 = sbr.rel (!%p12_p5) target bundleno = 2 (0x2), region = 73 }

</bundles_post_ra>
